<compile_context>
chip_gen: v7x
topology: tpu7x:2x2x1
jax: 0.10.0
libtpu: 0.0.40
codegen_flags: <defaults>
</compile_context>

<pallas_src>
import functools

import jax
import jax.numpy as jnp
from jax import lax
from jax.experimental import pallas as pl
from jax.experimental.pallas import tpu as pltpu

LANE = 128


def _round_up(n, m):
    return ((n + m - 1) // m) * m


def nlp_kernel(x_ref,       # (T, BB, I)          time-major batch block
               w_ih_t_ref,  # (I, 3*Hp)            gate columns r|z|n, lane-padded
               w_pack_ref,  # (Hp, 3*Hp + Op)      [W_hh^T | W_out^T], lane-padded
               b_ref,       # (3, 3*Hp)            rows: b_fused | b_hn | b_out(pad=-1e30)
               out_ref,     # (BB, Op)             softmax output (lane-dense)
               gx_ref):     # scratch (T*BB, 3*Hp) staged input projection
    T, BB, I = x_ref.shape
    Hp = w_pack_ref.shape[0]
    G3 = 3 * Hp
    Op = out_ref.shape[1]

    b_fused = b_ref[0:1, :]                      # (1, 3Hp)  (b_ir+b_hr | b_iz+b_hz | b_in)
    b_hn = b_ref[1:2, 0:Hp]                      # (1, Hp)   stays inside r*(...)
    b_out = b_ref[2:3, 0:Op]                     # (1, Op)   padded lanes are -1e30

    # Fused input projection for every (t, b): ONE (T*BB, I) @ (I, 3Hp) MXU op,
    # staged into VMEM scratch so the recurrence reads sublane-aligned rows back.
    x_flat = jnp.concatenate([x_ref[t] for t in range(T)], axis=0)   # (T*BB, I)
    gx_ref[...] = (jnp.dot(x_flat, w_ih_t_ref[...],
                           preferred_element_type=jnp.float32) + b_fused)

    # GRU recurrence, fully unrolled (T is static and small). Gate blocks sit on
    # 128-lane boundaries, so every slice below is a whole-vreg select.
    h = jnp.zeros((BB, Hp), jnp.float32)
    for t in range(T):
        gx = gx_ref[t * BB:(t + 1) * BB, :]                          # (BB, 3Hp) aligned load
        if t == 0:
            # h_0 == 0  =>  gh == 0: skip the recurrent matmul on step 0.
            rz = jax.nn.sigmoid(gx[:, 0:2 * Hp])                     # one wide EUP push
            r = rz[:, 0:Hp]
            z = rz[:, Hp:2 * Hp]
            n = jnp.tanh(gx[:, 2 * Hp:G3] + r * b_hn)
            h = (1.0 - z) * n
        else:
            gh = jnp.dot(h, w_pack_ref[:, 0:G3],
                         preferred_element_type=jnp.float32)         # (BB, 3Hp), 1 MXU op
            rz = jax.nn.sigmoid(gx[:, 0:2 * Hp] + gh[:, 0:2 * Hp])   # one wide EUP push
            r = rz[:, 0:Hp]
            z = rz[:, Hp:2 * Hp]
            n = jnp.tanh(gx[:, 2 * Hp:G3] + r * (gh[:, 2 * Hp:G3] + b_hn))
            h = n + z * (h - n)                                      # == (1-z)*n + z*h

    # Linear + Softmax over the last dim (matches nn.Softmax() on a 2-D input).
    # Padded logit lanes carry a -1e30 bias -> exp underflows to 0, so the softmax
    # denominator only sees the real O lanes; the wrapper slices [:, :O].
    logits = jnp.dot(h, w_pack_ref[:, G3:G3 + Op],
                     preferred_element_type=jnp.float32) + b_out
    m = jnp.max(logits, axis=-1, keepdims=True)
    e = jnp.exp(logits - m)
    out_ref[...] = (e / jnp.sum(e, axis=-1, keepdims=True)).astype(out_ref.dtype)


def init_params(key, input_size, hidden_size, output_size):
    """Deterministic init mimicking PyTorch's U(-1/sqrt(H), 1/sqrt(H))."""
    ks = jax.random.split(key, 6)
    bound = 1.0 / jnp.sqrt(jnp.float32(hidden_size))
    u = lambda k, shape: jax.random.uniform(k, shape, jnp.float32, -bound, bound)
    return {
        "w_ih": u(ks[0], (3 * hidden_size, input_size)),   # rows (r, z, n), PyTorch layout
        "w_hh": u(ks[1], (3 * hidden_size, hidden_size)),
        "b_ih": u(ks[2], (3 * hidden_size,)),
        "b_hh": u(ks[3], (3 * hidden_size,)),
        "w_out": u(ks[4], (output_size, hidden_size)),
        "b_out": u(ks[5], (output_size,)),
    }


def prepare_params(params):
    """One-time (outside the hot path) re-layout: transpose, pad gates to 128-lane
    boundaries, fold biases, and pack small operands into few buffers."""
    w_ih, w_hh = params["w_ih"], params["w_hh"]
    b_ih, b_hh = params["b_ih"], params["b_hh"]
    w_out, b_out = params["w_out"], params["b_out"]
    H = w_hh.shape[1]
    O = w_out.shape[0]
    Hp = _round_up(H, LANE)
    Op = _round_up(O, LANE)

    def pad_cols(w, n):
        return jnp.pad(w, ((0, 0), (0, n - w.shape[1])))

    def pad_vec(v, n):
        return jnp.pad(v, (0, n - v.shape[0]))

    # (I, 3*Hp): gate columns r|z|n each zero-padded to a 128-lane boundary.
    w_ih_t = jnp.concatenate(
        [pad_cols(w_ih[g * H:(g + 1) * H, :].T, Hp) for g in range(3)], axis=1)
    # (Hp, 3*Hp): padded rows are zero (they only ever multiply zero h lanes).
    w_hh_t = jnp.concatenate(
        [pad_cols(w_hh[g * H:(g + 1) * H, :].T, Hp) for g in range(3)], axis=1)
    w_hh_t = jnp.pad(w_hh_t, ((0, Hp - H), (0, 0)))
    # (Hp, Op): zero-padded; padded h lanes are always zero.
    w_out_t = jnp.pad(w_out.T, ((0, Hp - H), (0, Op - O)))
    # One packed weight operand: [W_hh^T | W_out^T].
    w_pack = jnp.concatenate([w_hh_t, w_out_t], axis=1)              # (Hp, 3*Hp+Op)

    # b_fused = (b_ir+b_hr | b_iz+b_hz | b_in); b_hn stays inside r*(...).
    b_fused = jnp.concatenate([
        pad_vec(b_ih[0:H] + b_hh[0:H], Hp),
        pad_vec(b_ih[H:2 * H] + b_hh[H:2 * H], Hp),
        pad_vec(b_ih[2 * H:3 * H], Hp)])                             # (3*Hp,)
    b_hn = pad_vec(b_hh[2 * H:3 * H], Hp)                            # (Hp,)
    # Padded logit lanes get -1e30 so softmax ignores them.
    b_out_p = jnp.full((Op,), -1e30, jnp.float32).at[0:O].set(b_out)
    biases = jnp.stack([b_fused,
                        pad_vec(b_hn, 3 * Hp),
                        pad_vec(b_out_p, 3 * Hp)])                   # (3, 3*Hp)

    return {"w_ih_t": w_ih_t, "w_pack": w_pack, "biases": biases}


@functools.partial(jax.jit, static_argnames=("out_size", "block_b"))
def nlp_forward_batched(xs, w_ih_t, w_pack, biases, *, out_size, block_b=8):
    """xs: (T, B, I) time-major stack of independent sequences -> (B, out_size)."""
    T, B, I = xs.shape
    Hp = w_pack.shape[0]
    Op = w_pack.shape[1] - 3 * Hp
    Bp = _round_up(B, block_b)
    if Bp != B:
        xs = jnp.pad(xs, ((0, 0), (0, Bp - B), (0, 0)))

    out = pl.pallas_call(
        nlp_kernel,
        out_shape=jax.ShapeDtypeStruct((Bp, Op), jnp.float32),
        grid_spec=pltpu.PrefetchScalarGridSpec(
            num_scalar_prefetch=0,
            grid=(Bp // block_b,),
            in_specs=[
                pl.BlockSpec((T, block_b, I), lambda b: (0, b, 0)),
                # Constant-index blocks: weights/biases loaded to VMEM once,
                # resident across all grid steps.
                pl.BlockSpec(w_ih_t.shape, lambda b: (0, 0)),
                pl.BlockSpec(w_pack.shape, lambda b: (0, 0)),
                pl.BlockSpec(biases.shape, lambda b: (0, 0)),
            ],
            out_specs=pl.BlockSpec((block_b, Op), lambda b: (b, 0)),
            scratch_shapes=[pltpu.VMEM((T * block_b, 3 * Hp), jnp.float32)],
        ),
        compiler_params=pltpu.CompilerParams(
            dimension_semantics=("parallel",)),   # megacore split on v7x
    )(xs, w_ih_t, w_pack, biases)
    return out[:B, :out_size]


def nlp_forward(x, prep, out_size):
    """Single-sequence forward matching the PyTorch module: x (T, I) -> (1, O)."""
    return nlp_forward_batched(x[:, None, :], prep["w_ih_t"], prep["w_pack"],
                               prep["biases"], out_size=out_size)


def nlp_reference(x, params):
    """Pure-JAX reference of the PyTorch forward (for the correctness check)."""
    H = params["w_hh"].shape[1]
    w_ih, w_hh, b_ih, b_hh = params["w_ih"], params["w_hh"], params["b_ih"], params["b_hh"]

    def cell(h, x_t):
        gi = x_t @ w_ih.T + b_ih
        gh = h @ w_hh.T + b_hh
        r = jax.nn.sigmoid(gi[0:H] + gh[0:H])
        z = jax.nn.sigmoid(gi[H:2 * H] + gh[H:2 * H])
        n = jnp.tanh(gi[2 * H:3 * H] + r * gh[2 * H:3 * H])
        h_new = (1.0 - z) * n + z * h
        return h_new, h_new

    h0 = jnp.zeros((H,), jnp.float32)
    h_last, _ = lax.scan(cell, h0, x)
    logits = h_last @ params["w_out"].T + params["b_out"]
    return jax.nn.softmax(logits)[None, :]


if __name__ == "__main__":
    seq_len, input_size, hidden_size, output_size = 8, 16, 32, 8
    batch = 16

    key = jax.random.PRNGKey(0)
    kx, kb, kp = jax.random.split(key, 3)
    params = init_params(kp, input_size, hidden_size, output_size)
    prep = prepare_params(params)

    # 1) Exactly the PyTorch module's forward: one (T, I) sequence -> (1, O).
    x = jax.random.normal(kx, (seq_len, input_size), jnp.float32)
    out1 = jax.block_until_ready(nlp_forward(x, prep, out_size=output_size))
    ref1 = nlp_reference(x, params)
    assert out1.shape == (1, output_size)
    assert jnp.allclose(out1, ref1, rtol=1e-5, atol=1e-5)

    # 2) Batched throughput path: (T, B, I) independent sequences -> (B, O).
    xs = jax.random.normal(kb, (seq_len, batch, input_size), jnp.float32)
    outb = jax.block_until_ready(
        nlp_forward_batched(xs, prep["w_ih_t"], prep["w_pack"], prep["biases"],
                            out_size=output_size))
    refb = jax.vmap(lambda s: nlp_reference(s, params)[0], in_axes=1)(xs)
    assert outb.shape == (batch, output_size)
    assert jnp.allclose(outb, refb, rtol=1e-5, atol=1e-5)

    print("KERNEL_OK")
</pallas_src>

<mosaic_0001>
module attributes {stable_mosaic.version = 11 : i64} {
  func.func @nlp_kernel(%arg0: i32, %arg1: memref<8x8x16xf32, #tpu.memory_space<vmem>>, %arg2: memref<16x384xf32, #tpu.memory_space<vmem>>, %arg3: memref<128x512xf32, #tpu.memory_space<vmem>>, %arg4: memref<3x384xf32, #tpu.memory_space<vmem>>, %arg5: memref<8x128xf32, #tpu.memory_space<vmem>>, %arg6: memref<64x384xf32, #tpu.memory_space<vmem>>) attributes {dimension_semantics = [#tpu.dimension_semantics<parallel>], iteration_bounds = array<i64: 1>, scalar_prefetch = 0 : i64, scratch_operands = 1 : i64, tpu.core_type = #tpu.core_type<tc>, window_params = [{transform_indices = @transform_0, window_bounds = array<i64: 8, 8, 16>}, {pipeline_mode = #tpu.pipeline_mode<synchronous>, transform_indices = @transform_1, window_bounds = array<i64: 16, 384>}, {pipeline_mode = #tpu.pipeline_mode<synchronous>, transform_indices = @transform_2, window_bounds = array<i64: 128, 512>}, {pipeline_mode = #tpu.pipeline_mode<synchronous>, transform_indices = @transform_3, window_bounds = array<i64: 3, 384>}, {transform_indices = @transform_4, window_bounds = array<i64: 8, 128>}]} {
    %c0 = arith.constant 0 : index
    %c0_0 = arith.constant 0 : index
    %0 = vector.load %arg4[%c0, %c0_0] : memref<3x384xf32, #tpu.memory_space<vmem>>, vector<1x384xf32>
    %c1 = arith.constant 1 : index
    %c0_1 = arith.constant 0 : index
    %1 = vector.load %arg4[%c1, %c0_1] : memref<3x384xf32, #tpu.memory_space<vmem>>, vector<1x128xf32>
    %c2 = arith.constant 2 : index
    %c0_2 = arith.constant 0 : index
    %2 = vector.load %arg4[%c2, %c0_2] : memref<3x384xf32, #tpu.memory_space<vmem>>, vector<1x128xf32>
    %c0_3 = arith.constant 0 : index
    %c0_4 = arith.constant 0 : index
    %c0_5 = arith.constant 0 : index
    %3 = vector.load %arg1[%c0_3, %c0_4, %c0_5] : memref<8x8x16xf32, #tpu.memory_space<vmem>>, vector<1x8x16xf32>
    %4 = vector.shape_cast %3 : vector<1x8x16xf32> to vector<8x16xf32>
    %c1_6 = arith.constant 1 : index
    %c0_7 = arith.constant 0 : index
    %c0_8 = arith.constant 0 : index
    %5 = vector.load %arg1[%c1_6, %c0_7, %c0_8] : memref<8x8x16xf32, #tpu.memory_space<vmem>>, vector<1x8x16xf32>
    %6 = vector.shape_cast %5 : vector<1x8x16xf32> to vector<8x16xf32>
    %c2_9 = arith.constant 2 : index
    %c0_10 = arith.constant 0 : index
    %c0_11 = arith.constant 0 : index
    %7 = vector.load %arg1[%c2_9, %c0_10, %c0_11] : memref<8x8x16xf32, #tpu.memory_space<vmem>>, vector<1x8x16xf32>
    %8 = vector.shape_cast %7 : vector<1x8x16xf32> to vector<8x16xf32>
    %c3 = arith.constant 3 : index
    %c0_12 = arith.constant 0 : index
    %c0_13 = arith.constant 0 : index
    %9 = vector.load %arg1[%c3, %c0_12, %c0_13] : memref<8x8x16xf32, #tpu.memory_space<vmem>>, vector<1x8x16xf32>
    %10 = vector.shape_cast %9 : vector<1x8x16xf32> to vector<8x16xf32>
    %c4 = arith.constant 4 : index
    %c0_14 = arith.constant 0 : index
    %c0_15 = arith.constant 0 : index
    %11 = vector.load %arg1[%c4, %c0_14, %c0_15] : memref<8x8x16xf32, #tpu.memory_space<vmem>>, vector<1x8x16xf32>
    %12 = vector.shape_cast %11 : vector<1x8x16xf32> to vector<8x16xf32>
    %c5 = arith.constant 5 : index
    %c0_16 = arith.constant 0 : index
    %c0_17 = arith.constant 0 : index
    %13 = vector.load %arg1[%c5, %c0_16, %c0_17] : memref<8x8x16xf32, #tpu.memory_space<vmem>>, vector<1x8x16xf32>
    %14 = vector.shape_cast %13 : vector<1x8x16xf32> to vector<8x16xf32>
    %c6 = arith.constant 6 : index
    %c0_18 = arith.constant 0 : index
    %c0_19 = arith.constant 0 : index
    %15 = vector.load %arg1[%c6, %c0_18, %c0_19] : memref<8x8x16xf32, #tpu.memory_space<vmem>>, vector<1x8x16xf32>
    %16 = vector.shape_cast %15 : vector<1x8x16xf32> to vector<8x16xf32>
    %c7 = arith.constant 7 : index
    %c0_20 = arith.constant 0 : index
    %c0_21 = arith.constant 0 : index
    %17 = vector.load %arg1[%c7, %c0_20, %c0_21] : memref<8x8x16xf32, #tpu.memory_space<vmem>>, vector<1x8x16xf32>
    %18 = vector.shape_cast %17 : vector<1x8x16xf32> to vector<8x16xf32>
    %19 = tpu.concatenate %4, %6, %8, %10, %12, %14, %16, %18 in 0 : vector<8x16xf32>, vector<8x16xf32>, vector<8x16xf32>, vector<8x16xf32>, vector<8x16xf32>, vector<8x16xf32>, vector<8x16xf32>, vector<8x16xf32> -> vector<64x16xf32>
    %c0_22 = arith.constant 0 : index
    %c0_23 = arith.constant 0 : index
    %20 = vector.load %arg2[%c0_22, %c0_23] : memref<16x384xf32, #tpu.memory_space<vmem>>, vector<16x384xf32>
    %cst = arith.constant dense<0.000000e+00> : vector<64x384xf32>
    %21 = tpu.matmul %19, %20, %cst {dimension_numbers = #tpu.dot_dimension_numbers<[1], [0], [0], [1], [0, 0, 1, 1], [], []>} : vector<64x16xf32>, vector<16x384xf32>, vector<64x384xf32> -> vector<64x384xf32>
    %22 = vector.broadcast %0 : vector<1x384xf32> to vector<64x384xf32>
    %23 = arith.addf %21, %22 : vector<64x384xf32>
    %c0_24 = arith.constant 0 : index
    %c0_25 = arith.constant 0 : index
    %24 = vector.load %arg6[%c0_24, %c0_25] : memref<64x384xf32, #tpu.memory_space<vmem>>, vector<64x384xf32>
    tpu.vector_store %arg6[%c0_24, %c0_25], %23 {strides = array<i32>} : memref<64x384xf32, #tpu.memory_space<vmem>>, vector<64x384xf32>,
    %c0_26 = arith.constant 0 : index
    %c0_27 = arith.constant 0 : index
    %25 = vector.load %arg6[%c0_26, %c0_27] : memref<64x384xf32, #tpu.memory_space<vmem>>, vector<8x384xf32>
    %26 = vector.extract_strided_slice %25 {offsets = [0, 0], sizes = [8, 256], strides = [1, 1]} : vector<8x384xf32> to vector<8x256xf32>
    %27 = arith.negf %26 : vector<8x256xf32>
    %28 = math.exp %27 : vector<8x256xf32>
    %cst_28 = arith.constant 1.000000e+00 : f32
    %29 = vector.broadcast %cst_28 : f32 to vector<8x256xf32>
    %30 = arith.addf %29, %28 : vector<8x256xf32>
    %31 = arith.divf %29, %30 : vector<8x256xf32>
    %32 = vector.extract_strided_slice %31 {offsets = [0, 0], sizes = [8, 128], strides = [1, 1]} : vector<8x256xf32> to vector<8x128xf32>
    %33 = vector.extract_strided_slice %31 {offsets = [0, 128], sizes = [8, 128], strides = [1, 1]} : vector<8x256xf32> to vector<8x128xf32>
    %34 = vector.extract_strided_slice %25 {offsets = [0, 256], sizes = [8, 128], strides = [1, 1]} : vector<8x384xf32> to vector<8x128xf32>
    %35 = vector.broadcast %1 : vector<1x128xf32> to vector<8x128xf32>
    %36 = arith.mulf %32, %35 : vector<8x128xf32>
    %37 = arith.addf %34, %36 : vector<8x128xf32>
    %38 = math.tanh %37 : vector<8x128xf32>
    %cst_29 = arith.constant 1.000000e+00 : f32
    %39 = vector.broadcast %cst_29 : f32 to vector<8x128xf32>
    %40 = arith.subf %39, %33 : vector<8x128xf32>
    %41 = arith.mulf %40, %38 : vector<8x128xf32>
    %c8 = arith.constant 8 : index
    %c0_30 = arith.constant 0 : index
    %42 = vector.load %arg6[%c8, %c0_30] : memref<64x384xf32, #tpu.memory_space<vmem>>, vector<8x384xf32>
    %c0_31 = arith.constant 0 : index
    %c0_32 = arith.constant 0 : index
    %43 = vector.load %arg3[%c0_31, %c0_32] : memref<128x512xf32, #tpu.memory_space<vmem>>, vector<128x384xf32>
    %cst_33 = arith.constant dense<0.000000e+00> : vector<8x384xf32>
    %44 = tpu.matmul %41, %43, %cst_33 {dimension_numbers = #tpu.dot_dimension_numbers<[1], [0], [0], [1], [0, 0, 1, 1], [], []>} : vector<8x128xf32>, vector<128x384xf32>, vector<8x384xf32> -> vector<8x384xf32>
    %45 = vector.extract_strided_slice %42 {offsets = [0, 0], sizes = [8, 256], strides = [1, 1]} : vector<8x384xf32> to vector<8x256xf32>
    %46 = vector.extract_strided_slice %44 {offsets = [0, 0], sizes = [8, 256], strides = [1, 1]} : vector<8x384xf32> to vector<8x256xf32>
    %47 = arith.addf %45, %46 : vector<8x256xf32>
    %48 = arith.negf %47 : vector<8x256xf32>
    %49 = math.exp %48 : vector<8x256xf32>
    %cst_34 = arith.constant 1.000000e+00 : f32
    %50 = vector.broadcast %cst_34 : f32 to vector<8x256xf32>
    %51 = arith.addf %50, %49 : vector<8x256xf32>
    %52 = arith.divf %50, %51 : vector<8x256xf32>
    %53 = vector.extract_strided_slice %52 {offsets = [0, 0], sizes = [8, 128], strides = [1, 1]} : vector<8x256xf32> to vector<8x128xf32>
    %54 = vector.extract_strided_slice %52 {offsets = [0, 128], sizes = [8, 128], strides = [1, 1]} : vector<8x256xf32> to vector<8x128xf32>
    %55 = vector.extract_strided_slice %42 {offsets = [0, 256], sizes = [8, 128], strides = [1, 1]} : vector<8x384xf32> to vector<8x128xf32>
    %56 = vector.extract_strided_slice %44 {offsets = [0, 256], sizes = [8, 128], strides = [1, 1]} : vector<8x384xf32> to vector<8x128xf32>
    %57 = vector.broadcast %1 : vector<1x128xf32> to vector<8x128xf32>
    %58 = arith.addf %56, %57 : vector<8x128xf32>
    %59 = arith.mulf %53, %58 : vector<8x128xf32>
    %60 = arith.addf %55, %59 : vector<8x128xf32>
    %61 = math.tanh %60 : vector<8x128xf32>
    %62 = arith.subf %41, %61 : vector<8x128xf32>
    %63 = arith.mulf %54, %62 : vector<8x128xf32>
    %64 = arith.addf %61, %63 : vector<8x128xf32>
    %c16 = arith.constant 16 : index
    %c0_35 = arith.constant 0 : index
    %65 = vector.load %arg6[%c16, %c0_35] : memref<64x384xf32, #tpu.memory_space<vmem>>, vector<8x384xf32>
    %c0_36 = arith.constant 0 : index
    %c0_37 = arith.constant 0 : index
    %66 = vector.load %arg3[%c0_36, %c0_37] : memref<128x512xf32, #tpu.memory_space<vmem>>, vector<128x384xf32>
    %cst_38 = arith.constant dense<0.000000e+00> : vector<8x384xf32>
    %67 = tpu.matmul %64, %66, %cst_38 {dimension_numbers = #tpu.dot_dimension_numbers<[1], [0], [0], [1], [0, 0, 1, 1], [], []>} : vector<8x128xf32>, vector<128x384xf32>, vector<8x384xf32> -> vector<8x384xf32>
    %68 = vector.extract_strided_slice %65 {offsets = [0, 0], sizes = [8, 256], strides = [1, 1]} : vector<8x384xf32> to vector<8x256xf32>
    %69 = vector.extract_strided_slice %67 {offsets = [0, 0], sizes = [8, 256], strides = [1, 1]} : vector<8x384xf32> to vector<8x256xf32>
    %70 = arith.addf %68, %69 : vector<8x256xf32>
    %71 = arith.negf %70 : vector<8x256xf32>
    %72 = math.exp %71 : vector<8x256xf32>
    %cst_39 = arith.constant 1.000000e+00 : f32
    %73 = vector.broadcast %cst_39 : f32 to vector<8x256xf32>
    %74 = arith.addf %73, %72 : vector<8x256xf32>
    %75 = arith.divf %73, %74 : vector<8x256xf32>
    %76 = vector.extract_strided_slice %75 {offsets = [0, 0], sizes = [8, 128], strides = [1, 1]} : vector<8x256xf32> to vector<8x128xf32>
    %77 = vector.extract_strided_slice %75 {offsets = [0, 128], sizes = [8, 128], strides = [1, 1]} : vector<8x256xf32> to vector<8x128xf32>
    %78 = vector.extract_strided_slice %65 {offsets = [0, 256], sizes = [8, 128], strides = [1, 1]} : vector<8x384xf32> to vector<8x128xf32>
    %79 = vector.extract_strided_slice %67 {offsets = [0, 256], sizes = [8, 128], strides = [1, 1]} : vector<8x384xf32> to vector<8x128xf32>
    %80 = vector.broadcast %1 : vector<1x128xf32> to vector<8x128xf32>
    %81 = arith.addf %79, %80 : vector<8x128xf32>
    %82 = arith.mulf %76, %81 : vector<8x128xf32>
    %83 = arith.addf %78, %82 : vector<8x128xf32>
    %84 = math.tanh %83 : vector<8x128xf32>
    %85 = arith.subf %64, %84 : vector<8x128xf32>
    %86 = arith.mulf %77, %85 : vector<8x128xf32>
    %87 = arith.addf %84, %86 : vector<8x128xf32>
    %c24 = arith.constant 24 : index
    %c0_40 = arith.constant 0 : index
    %88 = vector.load %arg6[%c24, %c0_40] : memref<64x384xf32, #tpu.memory_space<vmem>>, vector<8x384xf32>
    %c0_41 = arith.constant 0 : index
    %c0_42 = arith.constant 0 : index
    %89 = vector.load %arg3[%c0_41, %c0_42] : memref<128x512xf32, #tpu.memory_space<vmem>>, vector<128x384xf32>
    %cst_43 = arith.constant dense<0.000000e+00> : vector<8x384xf32>
    %90 = tpu.matmul %87, %89, %cst_43 {dimension_numbers = #tpu.dot_dimension_numbers<[1], [0], [0], [1], [0, 0, 1, 1], [], []>} : vector<8x128xf32>, vector<128x384xf32>, vector<8x384xf32> -> vector<8x384xf32>
    %91 = vector.extract_strided_slice %88 {offsets = [0, 0], sizes = [8, 256], strides = [1, 1]} : vector<8x384xf32> to vector<8x256xf32>
    %92 = vector.extract_strided_slice %90 {offsets = [0, 0], sizes = [8, 256], strides = [1, 1]} : vector<8x384xf32> to vector<8x256xf32>
    %93 = arith.addf %91, %92 : vector<8x256xf32>
    %94 = arith.negf %93 : vector<8x256xf32>
    %95 = math.exp %94 : vector<8x256xf32>
    %cst_44 = arith.constant 1.000000e+00 : f32
    %96 = vector.broadcast %cst_44 : f32 to vector<8x256xf32>
    %97 = arith.addf %96, %95 : vector<8x256xf32>
    %98 = arith.divf %96, %97 : vector<8x256xf32>
    %99 = vector.extract_strided_slice %98 {offsets = [0, 0], sizes = [8, 128], strides = [1, 1]} : vector<8x256xf32> to vector<8x128xf32>
    %100 = vector.extract_strided_slice %98 {offsets = [0, 128], sizes = [8, 128], strides = [1, 1]} : vector<8x256xf32> to vector<8x128xf32>
    %101 = vector.extract_strided_slice %88 {offsets = [0, 256], sizes = [8, 128], strides = [1, 1]} : vector<8x384xf32> to vector<8x128xf32>
    %102 = vector.extract_strided_slice %90 {offsets = [0, 256], sizes = [8, 128], strides = [1, 1]} : vector<8x384xf32> to vector<8x128xf32>
    %103 = vector.broadcast %1 : vector<1x128xf32> to vector<8x128xf32>
    %104 = arith.addf %102, %103 : vector<8x128xf32>
    %105 = arith.mulf %99, %104 : vector<8x128xf32>
    %106 = arith.addf %101, %105 : vector<8x128xf32>
    %107 = math.tanh %106 : vector<8x128xf32>
    %108 = arith.subf %87, %107 : vector<8x128xf32>
    %109 = arith.mulf %100, %108 : vector<8x128xf32>
    %110 = arith.addf %107, %109 : vector<8x128xf32>
    %c32 = arith.constant 32 : index
    %c0_45 = arith.constant 0 : index
    %111 = vector.load %arg6[%c32, %c0_45] : memref<64x384xf32, #tpu.memory_space<vmem>>, vector<8x384xf32>
    %c0_46 = arith.constant 0 : index
    %c0_47 = arith.constant 0 : index
    %112 = vector.load %arg3[%c0_46, %c0_47] : memref<128x512xf32, #tpu.memory_space<vmem>>, vector<128x384xf32>
    %cst_48 = arith.constant dense<0.000000e+00> : vector<8x384xf32>
    %113 = tpu.matmul %110, %112, %cst_48 {dimension_numbers = #tpu.dot_dimension_numbers<[1], [0], [0], [1], [0, 0, 1, 1], [], []>} : vector<8x128xf32>, vector<128x384xf32>, vector<8x384xf32> -> vector<8x384xf32>
    %114 = vector.extract_strided_slice %111 {offsets = [0, 0], sizes = [8, 256], strides = [1, 1]} : vector<8x384xf32> to vector<8x256xf32>
    %115 = vector.extract_strided_slice %113 {offsets = [0, 0], sizes = [8, 256], strides = [1, 1]} : vector<8x384xf32> to vector<8x256xf32>
    %116 = arith.addf %114, %115 : vector<8x256xf32>
    %117 = arith.negf %116 : vector<8x256xf32>
    %118 = math.exp %117 : vector<8x256xf32>
    %cst_49 = arith.constant 1.000000e+00 : f32
    %119 = vector.broadcast %cst_49 : f32 to vector<8x256xf32>
    %120 = arith.addf %119, %118 : vector<8x256xf32>
    %121 = arith.divf %119, %120 : vector<8x256xf32>
    %122 = vector.extract_strided_slice %121 {offsets = [0, 0], sizes = [8, 128], strides = [1, 1]} : vector<8x256xf32> to vector<8x128xf32>
    %123 = vector.extract_strided_slice %121 {offsets = [0, 128], sizes = [8, 128], strides = [1, 1]} : vector<8x256xf32> to vector<8x128xf32>
    %124 = vector.extract_strided_slice %111 {offsets = [0, 256], sizes = [8, 128], strides = [1, 1]} : vector<8x384xf32> to vector<8x128xf32>
    %125 = vector.extract_strided_slice %113 {offsets = [0, 256], sizes = [8, 128], strides = [1, 1]} : vector<8x384xf32> to vector<8x128xf32>
    %126 = vector.broadcast %1 : vector<1x128xf32> to vector<8x128xf32>
    %127 = arith.addf %125, %126 : vector<8x128xf32>
    %128 = arith.mulf %122, %127 : vector<8x128xf32>
    %129 = arith.addf %124, %128 : vector<8x128xf32>
    %130 = math.tanh %129 : vector<8x128xf32>
    %131 = arith.subf %110, %130 : vector<8x128xf32>
    %132 = arith.mulf %123, %131 : vector<8x128xf32>
    %133 = arith.addf %130, %132 : vector<8x128xf32>
    %c40 = arith.constant 40 : index
    %c0_50 = arith.constant 0 : index
    %134 = vector.load %arg6[%c40, %c0_50] : memref<64x384xf32, #tpu.memory_space<vmem>>, vector<8x384xf32>
    %c0_51 = arith.constant 0 : index
    %c0_52 = arith.constant 0 : index
    %135 = vector.load %arg3[%c0_51, %c0_52] : memref<128x512xf32, #tpu.memory_space<vmem>>, vector<128x384xf32>
    %cst_53 = arith.constant dense<0.000000e+00> : vector<8x384xf32>
    %136 = tpu.matmul %133, %135, %cst_53 {dimension_numbers = #tpu.dot_dimension_numbers<[1], [0], [0], [1], [0, 0, 1, 1], [], []>} : vector<8x128xf32>, vector<128x384xf32>, vector<8x384xf32> -> vector<8x384xf32>
    %137 = vector.extract_strided_slice %134 {offsets = [0, 0], sizes = [8, 256], strides = [1, 1]} : vector<8x384xf32> to vector<8x256xf32>
    %138 = vector.extract_strided_slice %136 {offsets = [0, 0], sizes = [8, 256], strides = [1, 1]} : vector<8x384xf32> to vector<8x256xf32>
    %139 = arith.addf %137, %138 : vector<8x256xf32>
    %140 = arith.negf %139 : vector<8x256xf32>
    %141 = math.exp %140 : vector<8x256xf32>
    %cst_54 = arith.constant 1.000000e+00 : f32
    %142 = vector.broadcast %cst_54 : f32 to vector<8x256xf32>
    %143 = arith.addf %142, %141 : vector<8x256xf32>
    %144 = arith.divf %142, %143 : vector<8x256xf32>
    %145 = vector.extract_strided_slice %144 {offsets = [0, 0], sizes = [8, 128], strides = [1, 1]} : vector<8x256xf32> to vector<8x128xf32>
    %146 = vector.extract_strided_slice %144 {offsets = [0, 128], sizes = [8, 128], strides = [1, 1]} : vector<8x256xf32> to vector<8x128xf32>
    %147 = vector.extract_strided_slice %134 {offsets = [0, 256], sizes = [8, 128], strides = [1, 1]} : vector<8x384xf32> to vector<8x128xf32>
    %148 = vector.extract_strided_slice %136 {offsets = [0, 256], sizes = [8, 128], strides = [1, 1]} : vector<8x384xf32> to vector<8x128xf32>
    %149 = vector.broadcast %1 : vector<1x128xf32> to vector<8x128xf32>
    %150 = arith.addf %148, %149 : vector<8x128xf32>
    %151 = arith.mulf %145, %150 : vector<8x128xf32>
    %152 = arith.addf %147, %151 : vector<8x128xf32>
    %153 = math.tanh %152 : vector<8x128xf32>
    %154 = arith.subf %133, %153 : vector<8x128xf32>
    %155 = arith.mulf %146, %154 : vector<8x128xf32>
    %156 = arith.addf %153, %155 : vector<8x128xf32>
    %c48 = arith.constant 48 : index
    %c0_55 = arith.constant 0 : index
    %157 = vector.load %arg6[%c48, %c0_55] : memref<64x384xf32, #tpu.memory_space<vmem>>, vector<8x384xf32>
    %c0_56 = arith.constant 0 : index
    %c0_57 = arith.constant 0 : index
    %158 = vector.load %arg3[%c0_56, %c0_57] : memref<128x512xf32, #tpu.memory_space<vmem>>, vector<128x384xf32>
    %cst_58 = arith.constant dense<0.000000e+00> : vector<8x384xf32>
    %159 = tpu.matmul %156, %158, %cst_58 {dimension_numbers = #tpu.dot_dimension_numbers<[1], [0], [0], [1], [0, 0, 1, 1], [], []>} : vector<8x128xf32>, vector<128x384xf32>, vector<8x384xf32> -> vector<8x384xf32>
    %160 = vector.extract_strided_slice %157 {offsets = [0, 0], sizes = [8, 256], strides = [1, 1]} : vector<8x384xf32> to vector<8x256xf32>
    %161 = vector.extract_strided_slice %159 {offsets = [0, 0], sizes = [8, 256], strides = [1, 1]} : vector<8x384xf32> to vector<8x256xf32>
    %162 = arith.addf %160, %161 : vector<8x256xf32>
    %163 = arith.negf %162 : vector<8x256xf32>
    %164 = math.exp %163 : vector<8x256xf32>
    %cst_59 = arith.constant 1.000000e+00 : f32
    %165 = vector.broadcast %cst_59 : f32 to vector<8x256xf32>
    %166 = arith.addf %165, %164 : vector<8x256xf32>
    %167 = arith.divf %165, %166 : vector<8x256xf32>
    %168 = vector.extract_strided_slice %167 {offsets = [0, 0], sizes = [8, 128], strides = [1, 1]} : vector<8x256xf32> to vector<8x128xf32>
    %169 = vector.extract_strided_slice %167 {offsets = [0, 128], sizes = [8, 128], strides = [1, 1]} : vector<8x256xf32> to vector<8x128xf32>
    %170 = vector.extract_strided_slice %157 {offsets = [0, 256], sizes = [8, 128], strides = [1, 1]} : vector<8x384xf32> to vector<8x128xf32>
    %171 = vector.extract_strided_slice %159 {offsets = [0, 256], sizes = [8, 128], strides = [1, 1]} : vector<8x384xf32> to vector<8x128xf32>
    %172 = vector.broadcast %1 : vector<1x128xf32> to vector<8x128xf32>
    %173 = arith.addf %171, %172 : vector<8x128xf32>
    %174 = arith.mulf %168, %173 : vector<8x128xf32>
    %175 = arith.addf %170, %174 : vector<8x128xf32>
    %176 = math.tanh %175 : vector<8x128xf32>
    %177 = arith.subf %156, %176 : vector<8x128xf32>
    %178 = arith.mulf %169, %177 : vector<8x128xf32>
    %179 = arith.addf %176, %178 : vector<8x128xf32>
    %c56 = arith.constant 56 : index
    %c0_60 = arith.constant 0 : index
    %180 = vector.load %arg6[%c56, %c0_60] : memref<64x384xf32, #tpu.memory_space<vmem>>, vector<8x384xf32>
    %c0_61 = arith.constant 0 : index
    %c0_62 = arith.constant 0 : index
    %181 = vector.load %arg3[%c0_61, %c0_62] : memref<128x512xf32, #tpu.memory_space<vmem>>, vector<128x384xf32>
    %cst_63 = arith.constant dense<0.000000e+00> : vector<8x384xf32>
    %182 = tpu.matmul %179, %181, %cst_63 {dimension_numbers = #tpu.dot_dimension_numbers<[1], [0], [0], [1], [0, 0, 1, 1], [], []>} : vector<8x128xf32>, vector<128x384xf32>, vector<8x384xf32> -> vector<8x384xf32>
    %183 = vector.extract_strided_slice %180 {offsets = [0, 0], sizes = [8, 256], strides = [1, 1]} : vector<8x384xf32> to vector<8x256xf32>
    %184 = vector.extract_strided_slice %182 {offsets = [0, 0], sizes = [8, 256], strides = [1, 1]} : vector<8x384xf32> to vector<8x256xf32>
    %185 = arith.addf %183, %184 : vector<8x256xf32>
    %186 = arith.negf %185 : vector<8x256xf32>
    %187 = math.exp %186 : vector<8x256xf32>
    %cst_64 = arith.constant 1.000000e+00 : f32
    %188 = vector.broadcast %cst_64 : f32 to vector<8x256xf32>
    %189 = arith.addf %188, %187 : vector<8x256xf32>
    %190 = arith.divf %188, %189 : vector<8x256xf32>
    %191 = vector.extract_strided_slice %190 {offsets = [0, 0], sizes = [8, 128], strides = [1, 1]} : vector<8x256xf32> to vector<8x128xf32>
    %192 = vector.extract_strided_slice %190 {offsets = [0, 128], sizes = [8, 128], strides = [1, 1]} : vector<8x256xf32> to vector<8x128xf32>
    %193 = vector.extract_strided_slice %180 {offsets = [0, 256], sizes = [8, 128], strides = [1, 1]} : vector<8x384xf32> to vector<8x128xf32>
    %194 = vector.extract_strided_slice %182 {offsets = [0, 256], sizes = [8, 128], strides = [1, 1]} : vector<8x384xf32> to vector<8x128xf32>
    %195 = vector.broadcast %1 : vector<1x128xf32> to vector<8x128xf32>
    %196 = arith.addf %194, %195 : vector<8x128xf32>
    %197 = arith.mulf %191, %196 : vector<8x128xf32>
    %198 = arith.addf %193, %197 : vector<8x128xf32>
    %199 = math.tanh %198 : vector<8x128xf32>
    %200 = arith.subf %179, %199 : vector<8x128xf32>
    %201 = arith.mulf %192, %200 : vector<8x128xf32>
    %202 = arith.addf %199, %201 : vector<8x128xf32>
    %c0_65 = arith.constant 0 : index
    %c384 = arith.constant 384 : index
    %203 = vector.load %arg3[%c0_65, %c384] : memref<128x512xf32, #tpu.memory_space<vmem>>, vector<128x128xf32>
    %cst_66 = arith.constant dense<0.000000e+00> : vector<8x128xf32>
    %204 = tpu.matmul %202, %203, %cst_66 {dimension_numbers = #tpu.dot_dimension_numbers<[1], [0], [0], [1], [0, 0, 1, 1], [], []>} : vector<8x128xf32>, vector<128x128xf32>, vector<8x128xf32> -> vector<8x128xf32>
    %205 = vector.broadcast %2 : vector<1x128xf32> to vector<8x128xf32>
    %206 = arith.addf %204, %205 : vector<8x128xf32>
    %cst_67 = arith.constant dense<0xFF800000> : vector<8xf32>
    %207 = vector.multi_reduction <maximumf>, %206, %cst_67 [1] : vector<8x128xf32> to vector<8xf32>
    %208 = vector.shape_cast %207 : vector<8xf32> to vector<8x1xf32>
    %209 = vector.broadcast %208 : vector<8x1xf32> to vector<8x128xf32>
    %210 = arith.subf %206, %209 : vector<8x128xf32>
    %211 = math.exp %210 : vector<8x128xf32>
    %cst_68 = arith.constant dense<0.000000e+00> : vector<8xf32>
    %212 = vector.multi_reduction <add>, %211, %cst_68 [1] : vector<8x128xf32> to vector<8xf32>
    %213 = vector.shape_cast %212 : vector<8xf32> to vector<8x1xf32>
    %214 = vector.broadcast %213 : vector<8x1xf32> to vector<8x128xf32>
    %215 = arith.divf %211, %214 : vector<8x128xf32>
    %c0_69 = arith.constant 0 : index
    %c0_70 = arith.constant 0 : index
    %216 = vector.load %arg5[%c0_69, %c0_70] : memref<8x128xf32, #tpu.memory_space<vmem>>, vector<8x128xf32>
    tpu.vector_store %arg5[%c0_69, %c0_70], %215 {strides = array<i32>} : memref<8x128xf32, #tpu.memory_space<vmem>>, vector<8x128xf32>,
    return
  }
  func.func @transform_0(%arg0: i32) -> (i32, i32, i32) {
    %c0_i32 = arith.constant 0 : i32
    %c0_i32_0 = arith.constant 0 : i32
    %c0_i32_1 = arith.constant 0 : i32
    return %c0_i32, %arg0, %c0_i32_0 : i32, i32, i32
  }
  func.func @transform_1(%arg0: i32) -> (i32, i32) {
    %c0_i32 = arith.constant 0 : i32
    %c0_i32_0 = arith.constant 0 : i32
    %c0_i32_1 = arith.constant 0 : i32
    return %c0_i32, %c0_i32_0 : i32, i32
  }
  func.func @transform_2(%arg0: i32) -> (i32, i32) {
    %c0_i32 = arith.constant 0 : i32
    %c0_i32_0 = arith.constant 0 : i32
    %c0_i32_1 = arith.constant 0 : i32
    return %c0_i32, %c0_i32_0 : i32, i32
  }
  func.func @transform_3(%arg0: i32) -> (i32, i32) {
    %c0_i32 = arith.constant 0 : i32
    %c0_i32_0 = arith.constant 0 : i32
    %c0_i32_1 = arith.constant 0 : i32
    return %c0_i32, %c0_i32_0 : i32, i32
  }
  func.func @transform_4(%arg0: i32) -> (i32, i32) {
    %c0_i32 = arith.constant 0 : i32
    %c0_i32_0 = arith.constant 0 : i32
    return %arg0, %c0_i32 : i32, i32
  }
}

</mosaic_0001>

<bundles_post_ra>
// kernel: nlp_forward_batched.1
= control target key start
LH: loop header
LB: loop body
LE: loop exit
PB: predicated region body
PF: predicated region fallthrough
CT: control target
= control target key end

     0   :  { %9 = vsyncpa [#allocation4], 0  ;;  %s2719_s15 = smov [#allocation3]   ;;  %s3234_s0 = inlined_call_operand.vmem [shape: f32[8,8,16], index: 0, kind: input, shape index: {}]   ;;  %s3235_s1 = inlined_call_operand.vmem [shape: f32[16,384], index: 1, kind: input, shape index: {}]   ;;  %s3236_s2 = inlined_call_operand.hbm [shape: f32[128,512], index: 2, kind: input, shape index: {}]   ;;  %s3237_s3 = inlined_call_operand.vmem [shape: f32[3,384], index: 3, kind: input, shape index: {}]   ;;  %s3238_s4 = inlined_call_operand.vmem [shape: f32[8,128], index: 4, kind: output, shape index: {}]  }
   0x1   :  { %s19_s16 = sshll.u32 %s2719_s15, 4  ;;  %s2695_s19 = scalar_lea.hbm %s3236_s2, 8192  ;;  %s20_s16 = int_to_ptr.vmem [resolvable:$true] %s19_s16 }
   0x2   :  { %p2696_p0 = scmp.ne.s32.totalorder %s3236_s2, %s2695_s19  ;;  %p2699_p1 = scmp.lt.u32.totalorder %s2695_s19, %s3236_s2 }
   0x4   :  { %p2701_p2 = pnand %p2699_p1, %p2696_p0 }
   0x6   :  { %2704 = shalt.err (!%p2701_p2)
}
   0x7   :  { %s2705_s24 = scalar_lea.vmem %s20_s16, 8192  ;;  %p2710_p4 = scmp.lt.s32.totalorder %s20_s16, %s20_s16 }
   0x8   :  { %p2706_p3 = scmp.ne.s32.totalorder %s20_s16, %s2705_s24  ;;  %p2711_p5 = scmp.lt.s32.totalorder %s2705_s24, %s2705_s24 }
   0xa   :  { %p2712_p6 = por %p2711_p5, %p2710_p4 }
   0xc   :  { %p2713_p7 = pnand %p2712_p6, %p2706_p3 }
   0xe   :  { %2716 = shalt.err (!%p2713_p7)
}
   0xf   :  { %s2720_s25 = smov 512   ;;  %s2721_s26 = smov 32  }
  0x10   :  { %25 = dma.hbm_to_vmem [thread:$0]  %s3236_s2, 8192, %s20_s16, [#allocation4], %s2720_s25, %s2720_s25, %s2721_s26  }
  0x11   :  { %2717 = dma.done.wait [#allocation4], 8192  }
  0x12   :  { %2718 = vsyncadd [#allocation4], 4294959104  ;;  %v2722_v0 = vmov 0.0   ;;  %v50_v1 = vld [vmem:[%s3235_s1 + $0x8] sm:$0xff]  ;;  %v53_v2 = vld [vmem:[%s3235_s1 + $0x20] sm:$0xff]  ;;  %vm71_vm0 = vcmask 130048  }
  0x13   :  { %160 = vmatprep.mubr.f32.mxu0 %v2722_v0  ;;  %v49_v3 = vld [vmem:[%s3235_s1] sm:$0xff]  ;;  %v2153_v4 = vpack.c.bf16 %v53_v2, %v50_v1  ;;  %v52_v5 = vld [vmem:[%s3235_s1 + $0x18] sm:$0xff]  ;;  %v51_v7 = vld [vmem:[%s3235_s1 + $0x10] sm:$0xff]  ;;  %v2723_v20 = vmov 0.0|0.0   ;;  %vm2724_vm1 = vmmov 0  }
  0x14   :  { %v34_v6 = vld [vmem:[%s3234_s0] sm:$0xff]  ;;  %v2155_v8 = vpack.c.bf16 %v52_v5, %v49_v3  ;;  %v54_v9 = vld [vmem:[%s3235_s1 + $0x28] sm:$0xff]  ;;  %v366_v12 = vld [vmem:[#allocation3 + $0x8] sm:$0xff] }
  0x15   :  { %1861 = vmatprep.mubr.msk.f32.mxu1 %vm71_vm0, %v34_v6  ;;  %2154 = vmatprep.subr.bf16.mxu0 %v2153_v4  ;;  %v2157_v10 = vpack.c.bf16 %v54_v9, %v51_v7  ;;  %v1670_v11 = vld [vmem:[%s3234_s0 + $0x8] sm:$0xff]  ;;  %v369_v13 = vld [vmem:[#allocation3 + $0x28] sm:$0xff]  ;;  %v365_v15 = vld [vmem:[#allocation3] sm:$0xff] }
  0x16   :  { %2156 = vmatpush1.bf16.msra.mxu0 %v2155_v8  ;;  %v2793_v14 = vpack.c.bf16 %v369_v13, %v366_v12  ;;  %v368_v16 = vld [vmem:[#allocation3 + $0x20] sm:$0xff]  ;;  %v367_v17 = vld [vmem:[#allocation3 + $0x10] sm:$0xff]  ;;  %v372_v22 = vld [vmem:[#allocation3 + $0x48] sm:$0xff] }
  0x17   :  { %2158 = vmatprep.subr.bf16.mxu1 %v2157_v10  ;;  %v2795_v18 = vpack.c.bf16 %v368_v16, %v365_v15  ;;  %v370_v19 = vld [vmem:[#allocation3 + $0x30] sm:$0xff]  ;;  %v375_v23 = vld [vmem:[#allocation3 + $0x68] sm:$0xff]  ;;  %v371_v25 = vld [vmem:[#allocation3 + $0x40] sm:$0xff] }
  0x18   :  { %2160 = vmatpush3.bf16.msra.mxu1 %v2157_v10  ;;  %2162 = vmatprep.subr.bf16.mxu0 %v2793_v14  ;;  %v2799_v21 = vpack.c.bf16 %v370_v19, %v367_v17  ;;  %v2803_v24 = vpack.c.bf16 %v375_v23, %v372_v22  ;;  %v374_v26 = vld [vmem:[#allocation3 + $0x60] sm:$0xff]  ;;  %v373_v27 = vld [vmem:[#allocation3 + $0x50] sm:$0xff]  ;;  %v378_v31 = vld [vmem:[#allocation3 + $0x88] sm:$0xff] }
  0x19   :  { %1677 = vmatmul.mubr.msk.f32.vlgmr.msra.gmra.mrb[0].mxu0 %vm71_vm0, %v34_v6  ;;  %2193 = vmatprep.subr.bf16.mxu1 %v2723_v20  ;;  %v2805_v28 = vpack.c.bf16 %v374_v26, %v371_v25  ;;  %v376_v29 = vld [vmem:[#allocation3 + $0x70] sm:$0xff]  ;;  %v381_v32 = vld [vmem:[#allocation3 + $0xa8] sm:$0xff]  ;;  %v377_v34 = vld [vmem:[#allocation3 + $0x80] sm:$0xff] }
  0x1a   :  { %166 = vmatprep.mubr.f32.mxu0 %v2722_v0  ;;  %2164 = vmatpush1.bf16.msra.mxu0 %v2795_v18  ;;  %v2809_v30 = vpack.c.bf16 %v376_v29, %v373_v27  ;;  %v2813_v33 = vpack.c.bf16 %v381_v32, %v378_v31  ;;  %v380_v35 = vld [vmem:[#allocation3 + $0xa0] sm:$0xff]  ;;  %v379_v36 = vld [vmem:[#allocation3 + $0x90] sm:$0xff]  ;;  %v384_v41 = vld [vmem:[#allocation3 + $0xc8] sm:$0xff] }
  0x1b   :  { %1862 = vmatmul.mubr.msk.f32.vlgmr.msra.gmra.mrb[0].mxu1 %vm71_vm0, %v1670_v11  ;;  %2166 = vmatprep.subr.bf16.mxu0 %v2803_v24  ;;  %v1671_v37 = vld [vmem:[%s3234_s0 + $0x10] sm:$0xff]  ;;  %v2818_v38 = vpack.c.bf16 %v380_v35, %v377_v34  ;;  %v382_v39 = vld [vmem:[#allocation3 + $0xb0] sm:$0xff]  ;;  %v387_v42 = vld [vmem:[#allocation3 + $0xe8] sm:$0xff] }
  0x1c   :  { %2195 = vmatpush3.bf16.msra.mxu1 %v2799_v21  ;;  %v2823_v40 = vpack.c.bf16 %v382_v39, %v379_v36  ;;  %v2828_v43 = vpack.c.bf16 %v387_v42, %v384_v41  ;;  %v383_v44 = vld [vmem:[#allocation3 + $0xc0] sm:$0xff]  ;;  %v385_v46 = vld [vmem:[#allocation3 + $0xd0] sm:$0xff]  ;;  %1864 = vmatprep.mubr.msk.f32.mxu1 %vm71_vm0, %v1671_v37  ;;  %v1672_v47 = vld [vmem:[%s3234_s0 + $0x18] sm:$0xff]  ;;  %v56_v36 = vlaneseq }
  0x1d   :  { %1678 = vmatmul.mubr.msk.f32.gmra.mrb[2].mxu0 %vm71_vm0, %v1670_v11  ;;  %2196 = vmatprep.subr.bf16.mxu1 %v2723_v20  ;;  %v386_v45 = vld [vmem:[#allocation3 + $0xe0] sm:$0xff]  ;;  %v388_v49 = vld [vmem:[#allocation3 + $0xf0] sm:$0xff]  ;;  %v390_v51 = vld [vmem:[#allocation3 + $0x108] sm:$0xff] }
  0x1e   :  { %172 = vmatprep.mubr.f32.mxu0 %v2722_v0  ;;  %2168 = vmatpush1.bf16.msra.mxu0 %v2805_v28  ;;  %v2834_v48 = vpack.c.bf16 %v386_v45, %v383_v44  ;;  %v2839_v50 = vpack.c.bf16 %v388_v49, %v385_v46  ;;  %v393_v52 = vld [vmem:[#allocation3 + $0x128] sm:$0xff]  ;;  %v389_v54 = vld [vmem:[#allocation3 + $0x100] sm:$0xff]  ;;  %v1673_v56 = vld [vmem:[%s3234_s0 + $0x20] sm:$0xff] }
  0x1f   :  { %2170 = vmatprep.subr.bf16.mxu0 %v2813_v33  ;;  %v2844_v53 = vpack.c.bf16 %v393_v52, %v390_v51  ;;  %v392_v55 = vld [vmem:[#allocation3 + $0x120] sm:$0xff]  ;;  %v391_v58 = vld [vmem:[#allocation3 + $0x110] sm:$0xff]  ;;  %1865 = vmatmul.mubr.msk.f32.gmra.mrb[2].mxu1 %vm71_vm0, %v1672_v47  ;;  %v396_v61 = vld [vmem:[#allocation3 + $0x148] sm:$0xff] }
  0x20   :  { %2198 = vmatpush3.bf16.msra.mxu1 %v2809_v30  ;;  %v2849_v57 = vpack.c.bf16 %v392_v55, %v389_v54  ;;  %v394_v59 = vld [vmem:[#allocation3 + $0x130] sm:$0xff]  ;;  %v399_v62 = vld [vmem:[#allocation3 + $0x168] sm:$0xff]  ;;  %v395_v1 = vld [vmem:[#allocation3 + $0x140] sm:$0xff]  ;;  %1867 = vmatprep.mubr.msk.f32.mxu1 %vm71_vm0, %v1673_v56 }
  0x21   :  { %2199 = vmatprep.subr.bf16.mxu1 %v2723_v20  ;;  %1679 = vmatmul.mubr.msk.f32.gmra.mrb[4].mxu0 %vm71_vm0, %v1671_v37  ;;  %v2855_v60 = vpack.c.bf16 %v394_v59, %v391_v58  ;;  %v2860_v63 = vpack.c.bf16 %v399_v62, %v396_v61  ;;  %v398_v2 = vld [vmem:[#allocation3 + $0x160] sm:$0xff]  ;;  %v397_v3 = vld [vmem:[#allocation3 + $0x150] sm:$0xff]  ;;  %v1674_v4 = vld [vmem:[%s3234_s0 + $0x28] sm:$0xff]  ;;  %v57_v37 = vshrl.u32 %v56_v36, 7 }
  0x22   :  { %2172 = vmatpush1.bf16.msra.mxu0 %v2818_v38  ;;  %178 = vmatprep.mubr.f32.mxu0 %v2722_v0  ;;  %v2866_v5 = vpack.c.bf16 %v398_v2, %v395_v1  ;;  %v400_v6 = vld [vmem:[#allocation3 + $0x170] sm:$0xff]  ;;  %v402_v7 = vld [vmem:[#allocation3 + $0x188] sm:$0xff]  ;;  %v1675_v10 = vld [vmem:[%s3234_s0 + $0x30] sm:$0xff] }
  0x23   :  { %2174 = vmatprep.subr.bf16.mxu0 %v2828_v43  ;;  %v2871_v8 = vpack.c.bf16 %v400_v6, %v397_v3  ;;  %v405_v9 = vld [vmem:[#allocation3 + $0x1a8] sm:$0xff]  ;;  %v401_v11 = vld [vmem:[#allocation3 + $0x180] sm:$0xff]  ;;  %v403_v15 = vld [vmem:[#allocation3 + $0x190] sm:$0xff]  ;;  %1868 = vmatmul.mubr.msk.f32.gmra.mrb[4].mxu1 %vm71_vm0, %v1674_v4  ;;  %v58_v39 = vsub.s32 0, %v57_v37  ;;  %v62_v42 = vsub.s32 1, %v57_v37  ;;  %v66_v61 = vsub.s32 2, %v57_v37 }
  0x24   :  { %2201 = vmatpush3.bf16.msra.mxu1 %v2823_v40  ;;  %v2878_v12 = vpack.c.bf16 %v405_v9, %v402_v7  ;;  %v404_v13 = vld [vmem:[#allocation3 + $0x1a0] sm:$0xff]  ;;  %v406_v16 = vld [vmem:[#allocation3 + $0x1b0] sm:$0xff]  ;;  %v408_v22 = vld [vmem:[#allocation3 + $0x1c8] sm:$0xff]  ;;  %1870 = vmatprep.mubr.msk.f32.mxu1 %vm71_vm0, %v1675_v10 }
  0x25   :  { %2202 = vmatprep.subr.bf16.mxu1 %v2723_v20  ;;  %1680 = vmatmul.mubr.msk.f32.gmra.mrb[6].mxu0 %vm71_vm0, %v1672_v47  ;;  %v2881_v17 = vpack.c.bf16 %v404_v13, %v401_v11  ;;  %v2883_v19 = vpack.c.bf16 %v406_v16, %v403_v15  ;;  %v411_v23 = vld [vmem:[#allocation3 + $0x1e8] sm:$0xff]  ;;  %v407_v26 = vld [vmem:[#allocation3 + $0x1c0] sm:$0xff]  ;;  %v409_v29 = vld [vmem:[#allocation3 + $0x1d0] sm:$0xff] }
  0x26   :  { %2176 = vmatpush1.bf16.msra.mxu0 %v2834_v48  ;;  %184 = vmatprep.mubr.f32.mxu0 %v2722_v0  ;;  %v2887_v25 = vpack.c.bf16 %v411_v23, %v408_v22  ;;  %v410_v27 = vld [vmem:[#allocation3 + $0x1e0] sm:$0xff]  ;;  %v1676_v31 = vld [vmem:[%s3234_s0 + $0x38] sm:$0xff]  ;;  %v412_v32 = vld [vmem:[#allocation3 + $0x1f0] sm:$0xff] }
  0x27   :  { %2178 = vmatprep.subr.bf16.mxu0 %v2844_v53  ;;  %v2896_v34 = vpack.c.bf16 %v410_v27, %v407_v26  ;;  %v2900_v35 = vpack.c.bf16 %v412_v32, %v409_v29  ;;  %1871 = vmatmul.mubr.msk.f32.gmra.mrb[6].mxu1 %vm71_vm0, %v1676_v31  ;;  %v31_v41 = vld [vmem:[%s3237_s3] ss:$4 sm:$0x7]  ;;  %v2929_v3 = vld [vmem:[%s3237_s3 + $0x1] ss:$0 sm:$0xff] }
  0x28   :  { %2204 = vmatpush3.bf16.msra.mxu1 %v2839_v50  ;;  %1905 = vmatprep.mubr.msk.f32.mxu1 %vm2724_vm1, %v2722_v0  ;;  %v2916_v44 = vrot.slane %v31_v41, %v58_v39  ;;  %v2918_v46 = vrot.slane %v31_v41, %v62_v42  ;;  %v2924_v1 = vrot.slane %v31_v41, %v66_v61 }
  0x29   :  { %2205 = vmatprep.subr.bf16.mxu1 %v2723_v20  ;;  %1681 = vmatmul.mubr.msk.f32.gmra.mrb[8].mxu0 %vm71_vm0, %v1673_v56 }
  0x2a   :  { %2180 = vmatpush1.bf16.msra.mxu0 %v2849_v57  ;;  %190 = vmatprep.mubr.f32.mxu0 %v2722_v0 }
  0x2b   :  { %2182 = vmatprep.subr.bf16.mxu0 %v2860_v63 }
  0x2c   :  { %2207 = vmatpush3.bf16.msra.mxu1 %v2855_v60 }
  0x2d   :  { %2208 = vmatprep.subr.bf16.mxu1 %v2723_v20  ;;  %1682 = vmatmul.mubr.msk.f32.gmra.mrb[10].mxu0 %vm71_vm0, %v1674_v4 }
  0x2e   :  { %2184 = vmatpush1.bf16.msra.mxu0 %v2866_v5  ;;  %196 = vmatprep.mubr.f32.mxu0 %v2722_v0 }
  0x2f   :  { %2186 = vmatprep.subr.bf16.mxu0 %v2878_v12 }
  0x30   :  { %2210 = vmatpush3.bf16.msra.mxu1 %v2871_v8 }
  0x31   :  { %1683 = vmatmul.mubr.msk.f32.gmra.mrb[12].mxu0 %vm71_vm0, %v1675_v10  ;;  %2211 = vmatprep.subr.bf16.mxu1 %v2723_v20 }
  0x32   :  { %2188 = vmatpush1.bf16.msra.mxu0 %v2881_v17  ;;  %202 = vmatprep.mubr.f32.mxu0 %v2722_v0 }
  0x33   :  { %2190 = vmatprep.subr.bf16.mxu0 %v2887_v25 }
  0x34   :  { %2213 = vmatpush3.bf16.msra.mxu1 %v2883_v19 }
  0x35   :  { %1684 = vmatmul.mubr.msk.f32.gmra.mrb[14].mxu0 %vm71_vm0, %v1676_v31  ;;  %2214 = vmatprep.subr.bf16.mxu1 %v2723_v20 }
  0x36   :  { %2192 = vmatpush1.bf16.msra.mxu0 %v2896_v34  ;;  %477 = vmatprep.mubr.f32.mxu0 %v2722_v0 }
  0x37   :  { %2218 = vmatprep.subr.bf16.mxu0 %v2793_v14 }
  0x38   :  { %2216 = vmatpush3.bf16.msra.mxu1 %v2900_v35 }
  0x39   :  { %2249 = vmatprep.subr.bf16.mxu1 %v2723_v20 }
  0xec   :  { %v162_v45 = vpop.f32.mrb[0].mxu0 }
  0xed   :  { %v163_v47 = vadd.f32 %v162_v45, %v2916_v44  ;;  %v164_v49 = vpop.f32.mrb[1].mxu0 }
  0xee   :  { %v2921_v51 = vpop.f32.mrb[0].mxu1  ;;  %v165_v55 = vadd.f32 %v164_v49, %v2918_v46 }
  0xef   :  { %v1693_v52 = vmul.f32 -1.442695, %v163_v47  ;;  %v275_v54 = vpop.f32.mrb[1].mxu1 }
  0xf0   :  { %v1694_v56 = vmul.f32 -1.442695, %v165_v55  ;;  %v276_v4 = vadd.f32 %v275_v54, %v2924_v1 }
  0xf1   :  { %2611 = vpow2.f32 %v1693_v52 }
  0xf2   :  { %2613 = vpow2.f32 %v1694_v56  ;;  %v2972_v16 = vpop.f32.mrb[2].mxu1  ;;  %v281_v56 = vadd.f32 %v2921_v51, %v2924_v1 }
  0xf3   :  { %v2974_v22 = vpop.f32.mrb[3].mxu1 }
  0xf6   :  { %v2976_v23 = vpop.f32.mrb[4].mxu1 }
  0xf7   :  { %v2978_v26 = vpop.f32.mrb[5].mxu1 }
  0xfa   :  { %v2980_v27 = vpop.f32.mrb[6].mxu1 }
  0xfb   :  { %v2612_v58 = vpop.eup %2611  ;;  %v2982_v29 = vpop.f32.mrb[7].mxu1 }
  0xfc   :  { %v347_v59 = vadd.f32 1.0, %v2612_v58  ;;  %v2614_v62 = vpop.eup %2613 }
  0xfd   :  { %v348_v2 = vadd.f32 1.0, %v2614_v62 }
  0xfe   :  { %2615 = vrcp.f32 %v347_v59 }
  0xff   :  { %2617 = vrcp.f32 %v348_v2 }
 0x108   :  { %v2616_v6 = vpop.eup %2615 }
 0x109   :  { %v357_v7 = vmul.f32 %v2616_v6, %v2929_v3  ;;  %v2618_v10 = vpop.eup %2617 }
 0x10a   :  { %v360_v11 = vsub.f32 1.0, %v2618_v10 }
 0x10b   :  { %v358_v9 = vadd.f32 %v357_v7, %v276_v4 }
 0x10d   :  { %2619 = vtanh.f32 %v358_v9 }
 0x117   :  { %v2620_v13 = vpop.eup %2619 }
 0x118   :  { %v2933_v15 = vmul.f32 %v2620_v13, %v360_v11 }
 0x11a   :  { %478 = vmatmul.mubr.f32.vlgmr.msra.gmra.mrb[2].mxu0 %v2933_v15  ;;  %1906 = vmatmul.mubr.f32.vlgmr.msra.gmra.mrb[8].mxu1 %v2933_v15 }
 0x11b   :  { %2220 = vmatpush1.bf16.msra.mxu0 %v2795_v18  ;;  %2251 = vmatpush3.bf16.msra.mxu1 %v2799_v21 }
 0x11c   :  { %2222 = vmatprep.subr.bf16.mxu0 %v2803_v24  ;;  %2252 = vmatprep.subr.bf16.mxu1 %v2723_v20 }
 0x11d   :  { %642 = vmatprep.mubr.f32.mxu0 %v2722_v0  ;;  %1940 = vmatprep.mubr.msk.f32.mxu1 %vm2724_vm1, %v2722_v0 }
 0x11f   :  { %2224 = vmatpush1.bf16.msra.mxu0 %v2805_v28  ;;  %2254 = vmatpush3.bf16.msra.mxu1 %v2809_v30 }
 0x120   :  { %2226 = vmatprep.subr.bf16.mxu0 %v2813_v33  ;;  %2255 = vmatprep.subr.bf16.mxu1 %v2723_v20 }
 0x123   :  { %2228 = vmatpush1.bf16.msra.mxu0 %v2818_v38  ;;  %2257 = vmatpush3.bf16.msra.mxu1 %v2823_v40 }
 0x124   :  { %2230 = vmatprep.subr.bf16.mxu0 %v2828_v43  ;;  %2258 = vmatprep.subr.bf16.mxu1 %v2723_v20 }
 0x127   :  { %2232 = vmatpush1.bf16.msra.mxu0 %v2834_v48  ;;  %2260 = vmatpush3.bf16.msra.mxu1 %v2839_v50 }
 0x128   :  { %2234 = vmatprep.subr.bf16.mxu0 %v2844_v53  ;;  %2261 = vmatprep.subr.bf16.mxu1 %v2723_v20 }
 0x12b   :  { %2236 = vmatpush1.bf16.msra.mxu0 %v2849_v57  ;;  %2263 = vmatpush3.bf16.msra.mxu1 %v2855_v60 }
 0x12c   :  { %2238 = vmatprep.subr.bf16.mxu0 %v2860_v63  ;;  %2264 = vmatprep.subr.bf16.mxu1 %v2723_v20 }
 0x12f   :  { %2240 = vmatpush1.bf16.msra.mxu0 %v2866_v5  ;;  %2266 = vmatpush3.bf16.msra.mxu1 %v2871_v8 }
 0x130   :  { %2242 = vmatprep.subr.bf16.mxu0 %v2878_v12  ;;  %2267 = vmatprep.subr.bf16.mxu1 %v2723_v20 }
 0x133   :  { %2244 = vmatpush1.bf16.msra.mxu0 %v2881_v17  ;;  %2269 = vmatpush3.bf16.msra.mxu1 %v2883_v19 }
 0x134   :  { %2246 = vmatprep.subr.bf16.mxu0 %v2887_v25  ;;  %2270 = vmatprep.subr.bf16.mxu1 %v2723_v20 }
 0x137   :  { %2248 = vmatpush1.bf16.msra.mxu0 %v2896_v34  ;;  %2272 = vmatpush3.bf16.msra.mxu1 %v2900_v35 }
 0x138   :  { %2274 = vmatprep.subr.bf16.mxu0 %v2793_v14  ;;  %2305 = vmatprep.subr.bf16.mxu1 %v2723_v20 }
 0x1ed   :  { %v479_v31 = vpop.f32.mrb[2].mxu0  ;;  %v550_v32 = vpop.f32.mrb[8].mxu1 }
 0x1ee   :  { %v2577_v36 = vadd.f32 %v479_v31, %v2916_v44  ;;  %v481_v37 = vpop.f32.mrb[3].mxu0  ;;  %v1907_v39 = vpop.f32.mrb[9].mxu1  ;;  %v568_v54 = vadd.f32 %v2929_v3, %v550_v32 }
 0x1ef   :  { %v2578_v42 = vadd.f32 %v481_v37, %v2918_v46 }
 0x1f0   :  { %v1696_v41 = vmul.f32 -1.442695, %v2577_v36 }
 0x1f1   :  { %v1697_v45 = vmul.f32 -1.442695, %v2578_v42 }
 0x1f2   :  { %2621 = vpow2.f32 %v1696_v41 }
 0x1f3   :  { %2623 = vpow2.f32 %v1697_v45  ;;  %v286_v45 = vadd.f32 %v2974_v22, %v2924_v1 }
 0x1fc   :  { %v2622_v47 = vpop.eup %2621 }
 0x1fd   :  { %v562_v49 = vadd.f32 1.0, %v2622_v47  ;;  %v2624_v52 = vpop.eup %2623 }
 0x1fe   :  { %v563_v61 = vadd.f32 1.0, %v2624_v52 }
 0x1ff   :  { %2625 = vrcp.f32 %v562_v49 }
 0x209   :  { %v2626_v55 = vpop.eup %2625 }
 0x20a   :  { %v569_v58 = vmul.f32 %v2626_v55, %v568_v54 }
 0x20c   :  { %v570_v59 = vadd.f32 %v569_v58, %v281_v56 }
 0x20e   :  { %2627 = vtanh.f32 %v570_v59 }
 0x20f   :  { %2629 = vrcp.f32 %v563_v61 }
 0x218   :  { %v2628_v62 = vpop.eup %2627 }
 0x219   :  { %v572_v2 = vsub.f32 %v2933_v15, %v2628_v62  ;;  %v2630_v4 = vpop.eup %2629 }
 0x21b   :  { %v573_v6 = vmul.f32 %v2630_v4, %v572_v2 }
 0x21d   :  { %v2990_v7 = vadd.f32 %v2628_v62, %v573_v6 }
 0x21f   :  { %643 = vmatmul.mubr.f32.vlgmr.msra.gmra.mrb[4].mxu0 %v2990_v7  ;;  %1941 = vmatmul.mubr.f32.vlgmr.msra.gmra.mrb[10].mxu1 %v2990_v7 }
 0x220   :  { %2276 = vmatpush1.bf16.msra.mxu0 %v2795_v18  ;;  %2307 = vmatpush3.bf16.msra.mxu1 %v2799_v21 }
 0x221   :  { %2278 = vmatprep.subr.bf16.mxu0 %v2803_v24  ;;  %2308 = vmatprep.subr.bf16.mxu1 %v2723_v20 }
 0x222   :  { %807 = vmatprep.mubr.f32.mxu0 %v2722_v0  ;;  %1975 = vmatprep.mubr.msk.f32.mxu1 %vm2724_vm1, %v2722_v0 }
 0x224   :  { %2280 = vmatpush1.bf16.msra.mxu0 %v2805_v28  ;;  %2310 = vmatpush3.bf16.msra.mxu1 %v2809_v30 }
 0x225   :  { %2282 = vmatprep.subr.bf16.mxu0 %v2813_v33  ;;  %2311 = vmatprep.subr.bf16.mxu1 %v2723_v20 }
 0x228   :  { %2284 = vmatpush1.bf16.msra.mxu0 %v2818_v38  ;;  %2313 = vmatpush3.bf16.msra.mxu1 %v2823_v40 }
 0x229   :  { %2286 = vmatprep.subr.bf16.mxu0 %v2828_v43  ;;  %2314 = vmatprep.subr.bf16.mxu1 %v2723_v20 }
 0x22c   :  { %2288 = vmatpush1.bf16.msra.mxu0 %v2834_v48  ;;  %2316 = vmatpush3.bf16.msra.mxu1 %v2839_v50 }
 0x22d   :  { %2290 = vmatprep.subr.bf16.mxu0 %v2844_v53  ;;  %2317 = vmatprep.subr.bf16.mxu1 %v2723_v20 }
 0x230   :  { %2292 = vmatpush1.bf16.msra.mxu0 %v2849_v57  ;;  %2319 = vmatpush3.bf16.msra.mxu1 %v2855_v60 }
 0x231   :  { %2294 = vmatprep.subr.bf16.mxu0 %v2860_v63  ;;  %2320 = vmatprep.subr.bf16.mxu1 %v2723_v20 }
 0x234   :  { %2296 = vmatpush1.bf16.msra.mxu0 %v2866_v5  ;;  %2322 = vmatpush3.bf16.msra.mxu1 %v2871_v8 }
 0x235   :  { %2298 = vmatprep.subr.bf16.mxu0 %v2878_v12  ;;  %2323 = vmatprep.subr.bf16.mxu1 %v2723_v20 }
 0x238   :  { %2300 = vmatpush1.bf16.msra.mxu0 %v2881_v17  ;;  %2325 = vmatpush3.bf16.msra.mxu1 %v2883_v19 }
 0x239   :  { %2302 = vmatprep.subr.bf16.mxu0 %v2887_v25  ;;  %2326 = vmatprep.subr.bf16.mxu1 %v2723_v20 }
 0x23c   :  { %2304 = vmatpush1.bf16.msra.mxu0 %v2896_v34  ;;  %2328 = vmatpush3.bf16.msra.mxu1 %v2900_v35 }
 0x23d   :  { %2330 = vmatprep.subr.bf16.mxu0 %v2793_v14  ;;  %2361 = vmatprep.subr.bf16.mxu1 %v2723_v20 }
 0x2f2   :  { %v644_v51 = vpop.f32.mrb[4].mxu0  ;;  %v715_v9 = vpop.f32.mrb[10].mxu1 }
 0x2f3   :  { %v2579_v10 = vadd.f32 %v644_v51, %v2916_v44  ;;  %v646_v11 = vpop.f32.mrb[5].mxu0  ;;  %v1942_v13 = vpop.f32.mrb[11].mxu1  ;;  %v733_v41 = vadd.f32 %v2929_v3, %v715_v9 }
 0x2f4   :  { %v2580_v31 = vadd.f32 %v646_v11, %v2918_v46 }
 0x2f5   :  { %v1698_v15 = vmul.f32 -1.442695, %v2579_v10 }
 0x2f6   :  { %v1699_v32 = vmul.f32 -1.442695, %v2580_v31  ;;  %v291_v31 = vadd.f32 %v2972_v16, %v2924_v1 }
 0x2f7   :  { %2631 = vpow2.f32 %v1698_v15 }
 0x2f8   :  { %2633 = vpow2.f32 %v1699_v32 }
 0x301   :  { %v2632_v36 = vpop.eup %2631 }
 0x302   :  { %v727_v37 = vadd.f32 1.0, %v2632_v36  ;;  %v2634_v39 = vpop.eup %2633 }
 0x303   :  { %v728_v52 = vadd.f32 1.0, %v2634_v39 }
 0x304   :  { %2635 = vrcp.f32 %v727_v37 }
 0x30e   :  { %v2636_v42 = vpop.eup %2635 }
 0x30f   :  { %v734_v47 = vmul.f32 %v2636_v42, %v733_v41 }
 0x311   :  { %v735_v49 = vadd.f32 %v734_v47, %v286_v45 }
 0x313   :  { %2637 = vtanh.f32 %v735_v49 }
 0x314   :  { %2639 = vrcp.f32 %v728_v52 }
 0x31d   :  { %v2638_v54 = vpop.eup %2637 }
 0x31e   :  { %v737_v55 = vsub.f32 %v2990_v7, %v2638_v54  ;;  %v2640_v56 = vpop.eup %2639 }
 0x320   :  { %v738_v58 = vmul.f32 %v2640_v56, %v737_v55 }
 0x322   :  { %v3035_v59 = vadd.f32 %v2638_v54, %v738_v58 }
 0x324   :  { %808 = vmatmul.mubr.f32.vlgmr.msra.gmra.mrb[6].mxu0 %v3035_v59  ;;  %1976 = vmatmul.mubr.f32.vlgmr.msra.gmra.mrb[12].mxu1 %v3035_v59 }
 0x325   :  { %2332 = vmatpush1.bf16.msra.mxu0 %v2795_v18  ;;  %2363 = vmatpush3.bf16.msra.mxu1 %v2799_v21 }
 0x326   :  { %2334 = vmatprep.subr.bf16.mxu0 %v2803_v24  ;;  %2364 = vmatprep.subr.bf16.mxu1 %v2723_v20 }
 0x327   :  { %972 = vmatprep.mubr.f32.mxu0 %v2722_v0  ;;  %2010 = vmatprep.mubr.msk.f32.mxu1 %vm2724_vm1, %v2722_v0 }
 0x329   :  { %2336 = vmatpush1.bf16.msra.mxu0 %v2805_v28  ;;  %2366 = vmatpush3.bf16.msra.mxu1 %v2809_v30 }
 0x32a   :  { %2338 = vmatprep.subr.bf16.mxu0 %v2813_v33  ;;  %2367 = vmatprep.subr.bf16.mxu1 %v2723_v20 }
 0x32d   :  { %2340 = vmatpush1.bf16.msra.mxu0 %v2818_v38  ;;  %2369 = vmatpush3.bf16.msra.mxu1 %v2823_v40 }
 0x32e   :  { %2342 = vmatprep.subr.bf16.mxu0 %v2828_v43  ;;  %2370 = vmatprep.subr.bf16.mxu1 %v2723_v20 }
 0x331   :  { %2344 = vmatpush1.bf16.msra.mxu0 %v2834_v48  ;;  %2372 = vmatpush3.bf16.msra.mxu1 %v2839_v50 }
 0x332   :  { %2346 = vmatprep.subr.bf16.mxu0 %v2844_v53  ;;  %2373 = vmatprep.subr.bf16.mxu1 %v2723_v20 }
 0x335   :  { %2348 = vmatpush1.bf16.msra.mxu0 %v2849_v57  ;;  %2375 = vmatpush3.bf16.msra.mxu1 %v2855_v60 }
 0x336   :  { %2350 = vmatprep.subr.bf16.mxu0 %v2860_v63  ;;  %2376 = vmatprep.subr.bf16.mxu1 %v2723_v20 }
 0x339   :  { %2352 = vmatpush1.bf16.msra.mxu0 %v2866_v5  ;;  %2378 = vmatpush3.bf16.msra.mxu1 %v2871_v8 }
 0x33a   :  { %2354 = vmatprep.subr.bf16.mxu0 %v2878_v12  ;;  %2379 = vmatprep.subr.bf16.mxu1 %v2723_v20 }
 0x33d   :  { %2356 = vmatpush1.bf16.msra.mxu0 %v2881_v17  ;;  %2381 = vmatpush3.bf16.msra.mxu1 %v2883_v19 }
 0x33e   :  { %2358 = vmatprep.subr.bf16.mxu0 %v2887_v25  ;;  %2382 = vmatprep.subr.bf16.mxu1 %v2723_v20 }
 0x341   :  { %2360 = vmatpush1.bf16.msra.mxu0 %v2896_v34  ;;  %2384 = vmatpush3.bf16.msra.mxu1 %v2900_v35 }
 0x342   :  { %2386 = vmatprep.subr.bf16.mxu0 %v2793_v14  ;;  %2417 = vmatprep.subr.bf16.mxu1 %v2723_v20 }
 0x3f7   :  { %v809_v22 = vpop.f32.mrb[6].mxu0  ;;  %v880_v61 = vpop.f32.mrb[12].mxu1 }
 0x3f8   :  { %v2581_v62 = vadd.f32 %v809_v22, %v2916_v44  ;;  %v811_v2 = vpop.f32.mrb[7].mxu0  ;;  %v1977_v4 = vpop.f32.mrb[13].mxu1  ;;  %v898_v13 = vadd.f32 %v2929_v3, %v880_v61 }
 0x3f9   :  { %v2582_v7 = vadd.f32 %v811_v2, %v2918_v46 }
 0x3fa   :  { %v1700_v6 = vmul.f32 -1.442695, %v2581_v62 }
 0x3fb   :  { %v1701_v51 = vmul.f32 -1.442695, %v2582_v7 }
 0x3fc   :  { %2641 = vpow2.f32 %v1700_v6  ;;  %v296_v6 = vadd.f32 %v2978_v26, %v2924_v1 }
 0x3fd   :  { %2643 = vpow2.f32 %v1701_v51 }
 0x406   :  { %v2642_v9 = vpop.eup %2641 }
 0x407   :  { %v892_v10 = vadd.f32 1.0, %v2642_v9  ;;  %v2644_v11 = vpop.eup %2643 }
 0x408   :  { %v893_v37 = vadd.f32 1.0, %v2644_v11 }
 0x409   :  { %2645 = vrcp.f32 %v892_v10 }
 0x413   :  { %v2646_v15 = vpop.eup %2645 }
 0x414   :  { %v899_v32 = vmul.f32 %v2646_v15, %v898_v13 }
 0x416   :  { %v900_v36 = vadd.f32 %v899_v32, %v291_v31 }
 0x418   :  { %2647 = vtanh.f32 %v900_v36 }
 0x419   :  { %2649 = vrcp.f32 %v893_v37 }
 0x422   :  { %v2648_v39 = vpop.eup %2647 }
 0x423   :  { %v902_v41 = vsub.f32 %v3035_v59, %v2648_v39  ;;  %v2650_v42 = vpop.eup %2649 }
 0x425   :  { %v903_v45 = vmul.f32 %v2650_v42, %v902_v41 }
 0x427   :  { %v3080_v47 = vadd.f32 %v2648_v39, %v903_v45 }
 0x429   :  { %973 = vmatmul.mubr.f32.vlgmr.msra.gmra.mrb[8].mxu0 %v3080_v47  ;;  %2011 = vmatmul.mubr.f32.vlgmr.msra.gmra.mrb[14].mxu1 %v3080_v47 }
 0x42a   :  { %2388 = vmatpush1.bf16.msra.mxu0 %v2795_v18  ;;  %2419 = vmatpush3.bf16.msra.mxu1 %v2799_v21 }
 0x42b   :  { %2390 = vmatprep.subr.bf16.mxu0 %v2803_v24  ;;  %2420 = vmatprep.subr.bf16.mxu1 %v2723_v20 }
 0x42c   :  { %1137 = vmatprep.mubr.f32.mxu0 %v2722_v0  ;;  %2045 = vmatprep.mubr.msk.f32.mxu1 %vm2724_vm1, %v2722_v0 }
 0x42e   :  { %2392 = vmatpush1.bf16.msra.mxu0 %v2805_v28  ;;  %2422 = vmatpush3.bf16.msra.mxu1 %v2809_v30 }
 0x42f   :  { %2394 = vmatprep.subr.bf16.mxu0 %v2813_v33  ;;  %2423 = vmatprep.subr.bf16.mxu1 %v2723_v20 }
 0x432   :  { %2396 = vmatpush1.bf16.msra.mxu0 %v2818_v38  ;;  %2425 = vmatpush3.bf16.msra.mxu1 %v2823_v40 }
 0x433   :  { %2398 = vmatprep.subr.bf16.mxu0 %v2828_v43  ;;  %2426 = vmatprep.subr.bf16.mxu1 %v2723_v20 }
 0x436   :  { %2400 = vmatpush1.bf16.msra.mxu0 %v2834_v48  ;;  %2428 = vmatpush3.bf16.msra.mxu1 %v2839_v50 }
 0x437   :  { %2402 = vmatprep.subr.bf16.mxu0 %v2844_v53  ;;  %2429 = vmatprep.subr.bf16.mxu1 %v2723_v20 }
 0x43a   :  { %2404 = vmatpush1.bf16.msra.mxu0 %v2849_v57  ;;  %2431 = vmatpush3.bf16.msra.mxu1 %v2855_v60 }
 0x43b   :  { %2406 = vmatprep.subr.bf16.mxu0 %v2860_v63  ;;  %2432 = vmatprep.subr.bf16.mxu1 %v2723_v20 }
 0x43e   :  { %2408 = vmatpush1.bf16.msra.mxu0 %v2866_v5  ;;  %2434 = vmatpush3.bf16.msra.mxu1 %v2871_v8 }
 0x43f   :  { %2410 = vmatprep.subr.bf16.mxu0 %v2878_v12  ;;  %2435 = vmatprep.subr.bf16.mxu1 %v2723_v20 }
 0x442   :  { %2412 = vmatpush1.bf16.msra.mxu0 %v2881_v17  ;;  %2437 = vmatpush3.bf16.msra.mxu1 %v2883_v19 }
 0x443   :  { %2414 = vmatprep.subr.bf16.mxu0 %v2887_v25  ;;  %2438 = vmatprep.subr.bf16.mxu1 %v2723_v20 }
 0x446   :  { %2416 = vmatpush1.bf16.msra.mxu0 %v2896_v34  ;;  %2440 = vmatpush3.bf16.msra.mxu1 %v2900_v35 }
 0x447   :  { %2442 = vmatprep.subr.bf16.mxu0 %v2793_v14  ;;  %2473 = vmatprep.subr.bf16.mxu1 %v2723_v20 }
 0x4fc   :  { %v974_v16 = vpop.f32.mrb[8].mxu0  ;;  %v1045_v49 = vpop.f32.mrb[14].mxu1 }
 0x4fd   :  { %v2583_v52 = vadd.f32 %v974_v16, %v2916_v44  ;;  %v976_v54 = vpop.f32.mrb[9].mxu0  ;;  %v2012_v55 = vpop.f32.mrb[15].mxu1  ;;  %v1063_v2 = vadd.f32 %v2929_v3, %v1045_v49 }
 0x4fe   :  { %v2584_v58 = vadd.f32 %v976_v54, %v2918_v46  ;;  %v301_v54 = vadd.f32 %v2976_v23, %v2924_v1  ;;  %v1566_v23 = vld [vmem:[#allocation3 + $0x38] sm:$0xff] }
 0x4ff   :  { %v1702_v56 = vmul.f32 -1.442695, %v2583_v52 }
 0x500   :  { %v1703_v59 = vmul.f32 -1.442695, %v2584_v58 }
 0x501   :  { %2651 = vpow2.f32 %v1702_v56 }
 0x502   :  { %2653 = vpow2.f32 %v1703_v59 }
 0x50b   :  { %v2652_v22 = vpop.eup %2651 }
 0x50c   :  { %v1057_v61 = vadd.f32 1.0, %v2652_v22  ;;  %v2654_v62 = vpop.eup %2653 }
 0x50d   :  { %v1058_v9 = vadd.f32 1.0, %v2654_v62 }
 0x50e   :  { %2655 = vrcp.f32 %v1057_v61 }
 0x518   :  { %v2656_v4 = vpop.eup %2655 }
 0x519   :  { %v1064_v7 = vmul.f32 %v2656_v4, %v1063_v2  ;;  %v1567_v4 = vld [vmem:[#allocation3 + $0x58] sm:$0xff] }
 0x51b   :  { %v1065_v51 = vadd.f32 %v1064_v7, %v296_v6  ;;  %v1568_v6 = vld [vmem:[#allocation3 + $0x78] sm:$0xff] }
 0x51c   :  { %v2557_v7 = vpack.c.bf16 %v1568_v6, %v1567_v4 }
 0x51d   :  { %2657 = vtanh.f32 %v1065_v51  ;;  %v1569_v51 = vld [vmem:[#allocation3 + $0x98] sm:$0xff] }
 0x51e   :  { %2659 = vrcp.f32 %v1058_v9  ;;  %v1570_v9 = vld [vmem:[#allocation3 + $0xb8] sm:$0xff] }
 0x527   :  { %v2658_v10 = vpop.eup %2657 }
 0x528   :  { %v1067_v11 = vsub.f32 %v3080_v47, %v2658_v10  ;;  %v2660_v13 = vpop.eup %2659 }
 0x52a   :  { %v1068_v15 = vmul.f32 %v2660_v13, %v1067_v11  ;;  %v1571_v11 = vld [vmem:[#allocation3 + $0xd8] sm:$0xff] }
 0x52c   :  { %v3125_v31 = vadd.f32 %v2658_v10, %v1068_v15  ;;  %v2560_v10 = vpack.c.bf16 %v1570_v9, %v1569_v51  ;;  %v1573_v15 = vld [vmem:[#allocation3 + $0x118] sm:$0xff] }
 0x52e   :  { %1138 = vmatmul.mubr.f32.vlgmr.msra.gmra.mrb[10].mxu0 %v3125_v31  ;;  %2046 = vmatmul.mubr.f32.vlgmr.msra.gmra.mrb[16].mxu1 %v3125_v31 }
 0x52f   :  { %2444 = vmatpush1.bf16.msra.mxu0 %v2795_v18  ;;  %2475 = vmatpush3.bf16.msra.mxu1 %v2799_v21 }
 0x530   :  { %2446 = vmatprep.subr.bf16.mxu0 %v2803_v24  ;;  %2476 = vmatprep.subr.bf16.mxu1 %v2723_v20 }
 0x531   :  { %1302 = vmatprep.mubr.f32.mxu0 %v2722_v0  ;;  %2080 = vmatprep.mubr.msk.f32.mxu1 %vm2724_vm1, %v2722_v0 }
 0x533   :  { %2448 = vmatpush1.bf16.msra.mxu0 %v2805_v28  ;;  %2478 = vmatpush3.bf16.msra.mxu1 %v2809_v30 }
 0x534   :  { %2450 = vmatprep.subr.bf16.mxu0 %v2813_v33  ;;  %2479 = vmatprep.subr.bf16.mxu1 %v2723_v20 }
 0x537   :  { %2452 = vmatpush1.bf16.msra.mxu0 %v2818_v38  ;;  %2481 = vmatpush3.bf16.msra.mxu1 %v2823_v40 }
 0x538   :  { %2454 = vmatprep.subr.bf16.mxu0 %v2828_v43  ;;  %2482 = vmatprep.subr.bf16.mxu1 %v2723_v20 }
 0x53b   :  { %2456 = vmatpush1.bf16.msra.mxu0 %v2834_v48  ;;  %2484 = vmatpush3.bf16.msra.mxu1 %v2839_v50 }
 0x53c   :  { %2458 = vmatprep.subr.bf16.mxu0 %v2844_v53  ;;  %2485 = vmatprep.subr.bf16.mxu1 %v2723_v20 }
 0x53f   :  { %2460 = vmatpush1.bf16.msra.mxu0 %v2849_v57  ;;  %2487 = vmatpush3.bf16.msra.mxu1 %v2855_v60 }
 0x540   :  { %2462 = vmatprep.subr.bf16.mxu0 %v2860_v63  ;;  %2488 = vmatprep.subr.bf16.mxu1 %v2723_v20 }
 0x543   :  { %2464 = vmatpush1.bf16.msra.mxu0 %v2866_v5  ;;  %2490 = vmatpush3.bf16.msra.mxu1 %v2871_v8 }
 0x544   :  { %2466 = vmatprep.subr.bf16.mxu0 %v2878_v12  ;;  %2491 = vmatprep.subr.bf16.mxu1 %v2723_v20 }
 0x547   :  { %2468 = vmatpush1.bf16.msra.mxu0 %v2881_v17  ;;  %2493 = vmatpush3.bf16.msra.mxu1 %v2883_v19 }
 0x548   :  { %2470 = vmatprep.subr.bf16.mxu0 %v2887_v25  ;;  %2494 = vmatprep.subr.bf16.mxu1 %v2723_v20 }
 0x54b   :  { %2472 = vmatpush1.bf16.msra.mxu0 %v2896_v34  ;;  %2496 = vmatpush3.bf16.msra.mxu1 %v2900_v35 }
 0x54c   :  { %2498 = vmatprep.subr.bf16.mxu0 %v2793_v14  ;;  %2529 = vmatprep.subr.bf16.mxu1 %v2723_v20 }
 0x601   :  { %v1139_v26 = vpop.f32.mrb[10].mxu0  ;;  %v1210_v32 = vpop.f32.mrb[16].mxu1 }
 0x602   :  { %v2585_v36 = vadd.f32 %v1139_v26, %v2916_v44  ;;  %v1141_v37 = vpop.f32.mrb[11].mxu0  ;;  %v2047_v39 = vpop.f32.mrb[17].mxu1  ;;  %v1228_v14 = vadd.f32 %v2929_v3, %v1210_v32  ;;  %v1575_v32 = vld [vmem:[#allocation3 + $0x158] sm:$0xff] }
 0x603   :  { %v2586_v42 = vadd.f32 %v1141_v37, %v2918_v46  ;;  %v1577_v39 = vld [vmem:[#allocation3 + $0x198] sm:$0xff] }
 0x604   :  { %v1704_v41 = vmul.f32 -1.442695, %v2585_v36  ;;  %v1576_v36 = vld [vmem:[#allocation3 + $0x178] sm:$0xff] }
 0x605   :  { %v1705_v45 = vmul.f32 -1.442695, %v2586_v42  ;;  %v2569_v37 = vpack.c.bf16 %v1576_v36, %v1575_v32 }
 0x606   :  { %2661 = vpow2.f32 %v1704_v41  ;;  %v1578_v41 = vld [vmem:[#allocation3 + $0x1b8] sm:$0xff] }
 0x607   :  { %2663 = vpow2.f32 %v1705_v45  ;;  %v2572_v42 = vpack.c.bf16 %v1578_v41, %v1577_v39  ;;  %v1579_v45 = vld [vmem:[#allocation3 + $0x1d8] sm:$0xff] }
 0x610   :  { %v2662_v47 = vpop.eup %2661 }
 0x611   :  { %v1222_v16 = vadd.f32 1.0, %v2662_v47  ;;  %v2664_v49 = vpop.eup %2663  ;;  %v1580_v47 = vld [vmem:[#allocation3 + $0x1f8] sm:$0xff] }
 0x612   :  { %v1223_v58 = vadd.f32 1.0, %v2664_v49 }
 0x613   :  { %2665 = vrcp.f32 %v1222_v16  ;;  %v2575_v16 = vpack.c.bf16 %v1580_v47, %v1579_v45 }
 0x61d   :  { %v2666_v52 = vpop.eup %2665 }
 0x61e   :  { %v1229_v55 = vmul.f32 %v2666_v52, %v1228_v14 }
 0x620   :  { %v1230_v56 = vadd.f32 %v1229_v55, %v301_v54 }
 0x622   :  { %2667 = vtanh.f32 %v1230_v56 }
 0x623   :  { %2669 = vrcp.f32 %v1223_v58 }
 0x62c   :  { %v2668_v59 = vpop.eup %2667 }
 0x62d   :  { %v1232_v22 = vsub.f32 %v3125_v31, %v2668_v59  ;;  %v2670_v61 = vpop.eup %2669  ;;  %v1574_v31 = vld [vmem:[#allocation3 + $0x138] sm:$0xff] }
 0x62e   :  { %v2566_v26 = vpack.c.bf16 %v1574_v31, %v1573_v15 }
 0x62f   :  { %v1233_v62 = vmul.f32 %v2670_v61, %v1232_v22 }
 0x631   :  { %v1234_v2 = vadd.f32 %v2668_v59, %v1233_v62 }
 0x633   :  { %1303 = vmatmul.mubr.f32.vlgmr.msra.gmra.mrb[12].mxu0 %v1234_v2  ;;  %2081 = vmatmul.mubr.f32.vlgmr.msra.gmra.mrb[18].mxu1 %v1234_v2 }
 0x634   :  { %2500 = vmatpush1.bf16.msra.mxu0 %v2795_v18  ;;  %2531 = vmatpush3.bf16.msra.mxu1 %v2799_v21 }
 0x635   :  { %2502 = vmatprep.subr.bf16.mxu0 %v2803_v24  ;;  %2532 = vmatprep.subr.bf16.mxu1 %v2723_v20 }
 0x636   :  { %1467 = vmatprep.mubr.f32.mxu0 %v2722_v0  ;;  %2115 = vmatprep.mubr.msk.f32.mxu1 %vm2724_vm1, %v2722_v0 }
 0x638   :  { %2504 = vmatpush1.bf16.msra.mxu0 %v2805_v28  ;;  %2534 = vmatpush3.bf16.msra.mxu1 %v2809_v30 }
 0x639   :  { %2506 = vmatprep.subr.bf16.mxu0 %v2813_v33  ;;  %2535 = vmatprep.subr.bf16.mxu1 %v2723_v20 }
 0x63c   :  { %2508 = vmatpush1.bf16.msra.mxu0 %v2818_v38  ;;  %2537 = vmatpush3.bf16.msra.mxu1 %v2823_v40 }
 0x63d   :  { %2510 = vmatprep.subr.bf16.mxu0 %v2828_v43  ;;  %2538 = vmatprep.subr.bf16.mxu1 %v2723_v20 }
 0x640   :  { %2512 = vmatpush1.bf16.msra.mxu0 %v2834_v48  ;;  %2540 = vmatpush3.bf16.msra.mxu1 %v2839_v50 }
 0x641   :  { %2514 = vmatprep.subr.bf16.mxu0 %v2844_v53  ;;  %2541 = vmatprep.subr.bf16.mxu1 %v2723_v20 }
 0x644   :  { %2516 = vmatpush1.bf16.msra.mxu0 %v2849_v57  ;;  %2543 = vmatpush3.bf16.msra.mxu1 %v2855_v60  ;;  %v306_v60 = vadd.f32 %v2982_v29, %v2924_v1 }
 0x645   :  { %2518 = vmatprep.subr.bf16.mxu0 %v2860_v63  ;;  %2544 = vmatprep.subr.bf16.mxu1 %v2723_v20 }
 0x648   :  { %2520 = vmatpush1.bf16.msra.mxu0 %v2866_v5  ;;  %2546 = vmatpush3.bf16.msra.mxu1 %v2871_v8 }
 0x649   :  { %2522 = vmatprep.subr.bf16.mxu0 %v2878_v12  ;;  %2547 = vmatprep.subr.bf16.mxu1 %v2723_v20 }
 0x64c   :  { %2524 = vmatpush1.bf16.msra.mxu0 %v2881_v17  ;;  %2549 = vmatpush3.bf16.msra.mxu1 %v2883_v19 }
 0x64d   :  { %2526 = vmatprep.subr.bf16.mxu0 %v2887_v25  ;;  %2550 = vmatprep.subr.bf16.mxu1 %v2723_v20 }
 0x650   :  { %2528 = vmatpush1.bf16.msra.mxu0 %v2896_v34  ;;  %2552 = vmatpush3.bf16.msra.mxu1 %v2900_v35  ;;  %v1565_v35 = vld [vmem:[#allocation3 + $0x18] sm:$0xff] }
 0x651   :  { %2553 = vmatprep.subr.bf16.mxu0 %v2723_v20  ;;  %v2554_v29 = vpack.c.bf16 %v1566_v23, %v1565_v35 }
 0x706   :  { %v1304_v18 = vpop.f32.mrb[12].mxu0  ;;  %v1375_v21 = vpop.f32.mrb[18].mxu1 }
 0x707   :  { %v2587_v24 = vadd.f32 %v1304_v18, %v2916_v44  ;;  %v1306_v28 = vpop.f32.mrb[13].mxu0  ;;  %v2082_v30 = vpop.f32.mrb[19].mxu1  ;;  %v1393_v53 = vadd.f32 %v2929_v3, %v1375_v21  ;;  %v311_v18 = vadd.f32 %v2980_v27, %v2924_v1 }
 0x708   :  { %v2588_v38 = vadd.f32 %v1306_v28, %v2918_v46 }
 0x709   :  { %v1706_v33 = vmul.f32 -1.442695, %v2587_v24 }
 0x70a   :  { %v1707_v40 = vmul.f32 -1.442695, %v2588_v38 }
 0x70b   :  { %2671 = vpow2.f32 %v1706_v33 }
 0x70c   :  { %2673 = vpow2.f32 %v1707_v40 }
 0x715   :  { %v2672_v43 = vpop.eup %2671 }
 0x716   :  { %v1387_v48 = vadd.f32 1.0, %v2672_v43  ;;  %v2674_v50 = vpop.eup %2673 }
 0x717   :  { %v1388_v8 = vadd.f32 1.0, %v2674_v50 }
 0x718   :  { %2675 = vrcp.f32 %v1387_v48 }
 0x722   :  { %v2676_v57 = vpop.eup %2675 }
 0x723   :  { %v1394_v63 = vmul.f32 %v2676_v57, %v1393_v53 }
 0x725   :  { %v1395_v5 = vadd.f32 %v1394_v63, %v306_v60 }
 0x727   :  { %2677 = vtanh.f32 %v1395_v5 }
 0x728   :  { %2679 = vrcp.f32 %v1388_v8 }
 0x731   :  { %v2678_v12 = vpop.eup %2677 }
 0x732   :  { %v1397_v17 = vsub.f32 %v1234_v2, %v2678_v12  ;;  %v2680_v19 = vpop.eup %2679 }
 0x734   :  { %v1398_v25 = vmul.f32 %v2680_v19, %v1397_v17 }
 0x736   :  { %v3209_v34 = vadd.f32 %v2678_v12, %v1398_v25 }
 0x738   :  { %1468 = vmatmul.mubr.f32.vlgmr.msra.gmra.mrb[14].mxu0 %v3209_v34  ;;  %2116 = vmatmul.mubr.f32.vlgmr.msra.gmra.mrb[20].mxu1 %v3209_v34 }
 0x739   :  { %2150 = vmatprep.mubr.msk.f32.mxu0 %vm2724_vm1, %v2722_v0  ;;  %2555 = vmatpush3.bf16.msra.mxu0 %v2554_v29  ;;  %v1572_v0 = vld [vmem:[#allocation3 + $0xf8] sm:$0xff] }
 0x73a   :  { %2556 = vmatprep.subr.bf16.mxu0 %v2723_v20  ;;  %v2563_v13 = vpack.c.bf16 %v1572_v0, %v1571_v11 }
 0x73d   :  { %2558 = vmatpush3.bf16.msra.mxu0 %v2557_v7 }
 0x73e   :  { %2559 = vmatprep.subr.bf16.mxu0 %v2723_v20 }
 0x741   :  { %2561 = vmatpush3.bf16.msra.mxu0 %v2560_v10 }
 0x742   :  { %2562 = vmatprep.subr.bf16.mxu0 %v2723_v20 }
 0x745   :  { %2564 = vmatpush3.bf16.msra.mxu0 %v2563_v13 }
 0x746   :  { %2565 = vmatprep.subr.bf16.mxu0 %v2723_v20 }
 0x749   :  { %2567 = vmatpush3.bf16.msra.mxu0 %v2566_v26 }
 0x74a   :  { %2568 = vmatprep.subr.bf16.mxu0 %v2723_v20 }
 0x74d   :  { %2570 = vmatpush3.bf16.msra.mxu0 %v2569_v37 }
 0x74e   :  { %2571 = vmatprep.subr.bf16.mxu0 %v2723_v20 }
 0x751   :  { %2573 = vmatpush3.bf16.msra.mxu0 %v2572_v42 }
 0x752   :  { %2574 = vmatprep.subr.bf16.mxu0 %v2723_v20 }
 0x755   :  { %2576 = vmatpush3.bf16.msra.mxu0 %v2575_v16 }
 0x80b   :  { %v1469_v49 = vpop.f32.mrb[14].mxu0  ;;  %v1540_v14 = vpop.f32.mrb[20].mxu1 }
 0x80c   :  { %v2589_v52 = vadd.f32 %v1469_v49, %v2916_v44  ;;  %v1471_v54 = vpop.f32.mrb[15].mxu0  ;;  %v2117_v55 = vpop.f32.mrb[21].mxu1  ;;  %v1558_v2 = vadd.f32 %v2929_v3, %v1540_v14  ;;  %v1710_v3 = vld [vmem:[%s3237_s3 + $0x2] ss:$0 sm:$0xff] }
 0x80d   :  { %v2590_v58 = vadd.f32 %v1471_v54, %v2918_v46 }
 0x80e   :  { %v1708_v56 = vmul.f32 -1.442695, %v2589_v52 }
 0x80f   :  { %v1709_v59 = vmul.f32 -1.442695, %v2590_v58 }
 0x810   :  { %2681 = vpow2.f32 %v1708_v56 }
 0x811   :  { %2683 = vpow2.f32 %v1709_v59 }
 0x81a   :  { %v2682_v22 = vpop.eup %2681 }
 0x81b   :  { %v1552_v61 = vadd.f32 1.0, %v2682_v22  ;;  %v2684_v62 = vpop.eup %2683 }
 0x81c   :  { %v1553_v24 = vadd.f32 1.0, %v2684_v62 }
 0x81d   :  { %2685 = vrcp.f32 %v1552_v61 }
 0x827   :  { %v2686_v20 = vpop.eup %2685 }
 0x828   :  { %v1559_v21 = vmul.f32 %v2686_v20, %v1558_v2 }
 0x82a   :  { %v1560_v44 = vadd.f32 %v1559_v21, %v311_v18 }
 0x82c   :  { %2687 = vtanh.f32 %v1560_v44 }
 0x82d   :  { %2689 = vrcp.f32 %v1553_v24 }
 0x836   :  { %v2688_v28 = vpop.eup %2687 }
 0x837   :  { %v1562_v46 = vsub.f32 %v3209_v34, %v2688_v28  ;;  %v2690_v30 = vpop.eup %2689 }
 0x839   :  { %v1563_v33 = vmul.f32 %v2690_v30, %v1562_v46 }
 0x83b   :  { %v1564_v38 = vadd.f32 %v2688_v28, %v1563_v33 }
 0x83d   :  { %2151 = vmatmul.mubr.f32.vlgmr.msra.gmra.mrb[16].mxu0 %v1564_v38 }
 0x910   :  { %v1651_v40 = vpop.f32.mrb[16].mxu0 }
 0x911   :  { %v1652_v43 = vadd.f32 %v1710_v3, %v1651_v40  ;;  %v2152_v48 = vpop.f32.mrb[17].mxu0 }
 0x913   :  { %1655 = vmax.xlane.f32.xlu0 %v1652_v43 }
 0x9a0   :  { %v1656_v1 = vpop.xlane.xlu0 %1655 }
 0x9a1   :  { %v1657_v27 = vsub.f32 %v1652_v43, %v1656_v1 }
 0x9a3   :  { %v1658_v50 = vmul.f32 1.442695, %v1657_v27 }
 0x9a5   :  { %2691 = vpow2.f32 %v1658_v50 }
 0x9af   :  { %v2692_v53 = vpop.eup %2691 }
 0x9b0   :  { %1660 = vadd.xlane.f32.xlu0 %v2692_v53 }
 0xa3d   :  { %v1661_v57 = vpop.xlane.xlu0 %1660 }
 0xa3e   :  { %2693 = vrcp.f32 %v1661_v57 }
 0xa48   :  { %v2694_v60 = vpop.eup %2693 }
 0xa49   :  { %v1663_v63 = vmul.f32 %v2694_v60, %v2692_v53 }
 0xa4b   :  { %1664 = vst [vmem:[%s3238_s4] sm:$0xff] %v1663_v63 }
 0xa4c   :  { %1669 = vsyncpa [#allocation4], 1 }

</bundles_post_ra>
